<compile_context>
chip_gen: v7x
topology: tpu7x:2x2x1
jax: 0.10.0
libtpu: 0.0.40
codegen_flags: <defaults>
</compile_context>

<pallas_src>
import functools

import jax
import jax.numpy as jnp
from jax.experimental import pallas as pl
from jax.experimental.pallas import tpu as pltpu

LANE = 128


def _round_up(v: int, m: int) -> int:
    return ((v + m - 1) // m) * m


def _vmem_capacity_bytes() -> int:
    """Physical VMEM per TensorCore; conservative fallback if the query is unavailable."""
    try:
        return int(pltpu.get_tpu_info().vmem_capacity_bytes)
    except Exception:
        return 64 * 1024 * 1024  # v7x per-TC VMEM (the smallest current generation)


@functools.lru_cache(maxsize=None)
def _single_buffer_supported() -> bool:
    """Probe whether pipeline_mode=pl.Buffered(1) works on this JAX/libtpu install."""
    try:
        def _copy(x_ref, o_ref):
            o_ref[...] = x_ref[...]

        fn = pl.pallas_call(
            _copy,
            out_shape=jax.ShapeDtypeStruct((16, 128), jnp.float32),
            grid=(2,),
            in_specs=[pl.BlockSpec((8, 128), lambda i: (0, 0),
                                   pipeline_mode=pl.Buffered(buffer_count=1))],
            out_specs=pl.BlockSpec((8, 128), lambda i: (i, 0)),
        )
        jax.block_until_ready(fn(jnp.zeros((8, 128), jnp.float32)))
        return True
    except Exception:
        return False


def _mhsa_kernel(x_ref, wqkv_ref, bqkv_ref, wo_ref, bo_ref, o_ref, ctx_ref, *,
                 num_heads, dh_pad):
    """One batch block: fused QKV matmul -> per-head attention -> one output matmul."""
    bblk, n, d_in = x_ref.shape
    dmp = wqkv_ref.shape[1] // 3          # padded model dim = num_heads * dh_pad
    d_out = wo_ref.shape[1]               # padded (lane-multiple) output width
    rows = bblk * n
    cdt = wqkv_ref.dtype                  # matmul operand dtype (bf16 by default)

    # Fused QKV projection on the flattened (rows, D) slab; f32 accumulate, f32 bias
    # add, then a SINGLE cast of the whole slab to the compute dtype.
    x = x_ref[...].reshape(rows, d_in).astype(cdt)
    qkv = jnp.dot(x, wqkv_ref[...], preferred_element_type=jnp.float32)
    qkv = (qkv + bqkv_ref[...]).astype(cdt)          # (rows, 3*dmp)
    qkv = qkv.reshape(bblk, n, 3 * dmp)              # leading-dim split only (cheap)

    for h in range(num_heads):                       # short static loop over heads
        off = h * dh_pad                             # lane-tile aligned (dh_pad % 128 == 0)
        q_h = qkv[:, :, off:off + dh_pad]                        # (bblk, n, dh_pad)
        k_h = qkv[:, :, dmp + off:dmp + off + dh_pad]
        v_h = qkv[:, :, 2 * dmp + off:2 * dmp + off + dh_pad]

        # QK^T without an explicit transpose; 1/sqrt(head_dim) is already folded into
        # the Q weight columns/bias, and the zero-padded lanes contribute nothing.
        s = jnp.einsum('bqd,bkd->bqk', q_h, k_h,
                       preferred_element_type=jnp.float32)       # (bblk, n, n) f32
        # Softmax stays in f32 (exp -> EUP, row reductions -> XLU: slots the MXU
        # does not use; bf16 elementwise would only add converts, esp. on v5e).
        s = s - jnp.max(s, axis=-1, keepdims=True)
        p = jnp.exp(s)
        p = p * pl.reciprocal(jnp.sum(p, axis=-1, keepdims=True), approx=True)

        ctx = jnp.einsum('bqk,bkd->bqd', p.astype(cdt), v_h,
                         preferred_element_type=jnp.float32)     # (bblk, n, dh_pad)
        # Park this head's context in VMEM scratch (lane-aligned store); bounds the
        # register live-set of the unrolled head loop.
        ctx_ref[:, off:off + dh_pad] = ctx.reshape(rows, dh_pad).astype(cdt)

    # Single output projection with contracting dim K = num_heads * dh_pad instead of
    # num_heads small K=dh matmuls (better MXU cadence, fewer drain phases).
    out = jnp.dot(ctx_ref[...], wo_ref[...], preferred_element_type=jnp.float32)
    out = out + bo_ref[...]
    o_ref[...] = out.reshape(bblk, n, d_out).astype(o_ref.dtype)


def mhsa_pallas(x, wqkv, bqkv, wo, bo, *, num_heads, batch_block=None,
                compute_dtype=jnp.bfloat16, min_grid_steps=2):
    """Forward pass of MultiHeadSelfAttention (concat merge, bottleneck_ratio=1).

    x: (B, N, D).  wqkv: (D, 3*Dm) in the module's per-head interleaved [q|k|v]
    column order, bqkv: (1, 3*Dm), wo: (Dm, D), bo: (1, D).  compute_dtype controls
    MXU operand dtype (bf16 default); accumulation and softmax are always f32.
    """
    B, N, D = x.shape
    Dm3 = wqkv.shape[1]
    Dm = Dm3 // 3
    assert Dm % num_heads == 0, "d_model must be divisible by num_heads"
    dh = Dm // num_heads
    Dout = wo.shape[1]
    cdt = jnp.dtype(compute_dtype) if compute_dtype is not None else jnp.dtype(x.dtype)

    # Pad per-head width and output width to lane multiples (no-op when already aligned).
    dh_p = _round_up(dh, LANE)
    Dm_p = num_heads * dh_p
    Dout_p = _round_up(Dout, LANE)

    # ---- one-time parameter repack (plain JAX, outside the kernel) ----
    # Interleaved per-head columns (h, {q,k,v}, j) -> packed (part, h, j_padded), i.e.
    # [Q_all | K_all | V_all] with heads contiguous and each head padded to dh_p lanes.
    wqkv_r = wqkv.astype(jnp.float32).reshape(D, num_heads, 3, dh).transpose(0, 2, 1, 3)
    bqkv_r = bqkv.astype(jnp.float32).reshape(1, num_heads, 3, dh).transpose(0, 2, 1, 3)
    if dh_p != dh:
        pad = ((0, 0), (0, 0), (0, 0), (0, dh_p - dh))
        wqkv_r = jnp.pad(wqkv_r, pad)
        bqkv_r = jnp.pad(bqkv_r, pad)
    scale = 1.0 / float(dh) ** 0.5                     # d_k uses the TRUE head dim
    wqkv_r = wqkv_r.at[:, 0].multiply(scale)           # fold scale into Q weights
    bqkv_r = bqkv_r.at[:, 0].multiply(scale)           # ... and Q bias
    wqkv_p = wqkv_r.reshape(D, 3 * Dm_p).astype(cdt)   # cast weights ONCE
    bqkv_p = bqkv_r.reshape(1, 3 * Dm_p)               # bias stays f32 (added post-matmul)

    wo_r = wo.astype(jnp.float32).reshape(num_heads, dh, Dout)
    wo_r = jnp.pad(wo_r, ((0, 0), (0, dh_p - dh), (0, Dout_p - Dout)))
    wo_p = wo_r.reshape(Dm_p, Dout_p).astype(cdt)
    bo_p = jnp.pad(bo.astype(jnp.float32), ((0, 0), (0, Dout_p - Dout)))

    # ---- VMEM-budget-driven batch block (largest divisor of B that fits) ----
    vmem_cap = _vmem_capacity_bytes()
    budget = int(vmem_cap * 0.65)
    x_bytes = jnp.dtype(x.dtype).itemsize
    cdt_bytes = cdt.itemsize

    def _est(bb):  # rough per-step working-set estimate (bytes)
        rows = bb * N
        weights = (D * 3 * Dm_p + Dm_p * Dout_p) * cdt_bytes + (3 * Dm_p + Dout_p) * 4
        io = 2 * rows * D * x_bytes + 2 * rows * Dout_p * x_bytes   # pipelined blocks
        qkv = rows * 3 * Dm_p * (4 + cdt_bytes)                     # f32 result + cdt copy
        attn = 2 * bb * N * N * 4 + rows * dh_p * (4 + cdt_bytes)   # scores/probs + ctx
        ctx = rows * Dm_p * cdt_bytes                               # VMEM scratch
        proj = rows * Dout_p * 4
        return int(1.25 * (weights + io + qkv + attn + ctx + proj))

    if batch_block is None:
        divisors = [d for d in range(1, B + 1) if B % d == 0]
        fitting = [d for d in divisors if _est(d) <= budget] or [1]
        preferred = [d for d in fitting if B // d >= min_grid_steps]
        batch_block = max(preferred) if preferred else max(fitting)
    if B % batch_block != 0:
        raise ValueError(f"batch {B} is not divisible by batch_block {batch_block}")
    grid = (B // batch_block,)

    # Grid-invariant params: single-buffered when supported (saves one weight-sized
    # VMEM buffer per param, which buys a larger batch_block under v7x's 64 MiB).
    if _single_buffer_supported():
        def inv_spec(shape):
            return pl.BlockSpec(shape, lambda b: (0,) * len(shape),
                                pipeline_mode=pl.Buffered(buffer_count=1))
    else:
        def inv_spec(shape):
            return pl.BlockSpec(shape, lambda b: (0,) * len(shape))

    kernel = functools.partial(_mhsa_kernel, num_heads=num_heads, dh_pad=dh_p)
    out = pl.pallas_call(
        kernel,
        out_shape=jax.ShapeDtypeStruct((B, N, Dout_p), x.dtype),
        grid=grid,
        in_specs=[
            pl.BlockSpec((batch_block, N, D), lambda b: (b, 0, 0)),   # x block
            inv_spec((D, 3 * Dm_p)),                                  # Wqkv (resident)
            inv_spec((1, 3 * Dm_p)),                                  # bqkv
            inv_spec((Dm_p, Dout_p)),                                 # Wo (resident)
            inv_spec((1, Dout_p)),                                    # bo
        ],
        out_specs=pl.BlockSpec((batch_block, N, Dout_p), lambda b: (b, 0, 0)),
        scratch_shapes=[pltpu.VMEM((batch_block * N, Dm_p), cdt)],     # ctx slab
        compiler_params=pltpu.CompilerParams(
            dimension_semantics=("parallel",),
            vmem_limit_bytes=int(vmem_cap * 0.9)),
    )(x, wqkv_p, bqkv_p, wo_p, bo_p)

    return out[..., :Dout] if Dout_p != Dout else out


def mhsa_reference(x, wqkv, bqkv, wo, bo, *, num_heads):
    """Pure-JAX reimplementation of the PyTorch forward (concat merge)."""
    B, N, D = x.shape
    Dm3 = wqkv.shape[1]
    Dm = Dm3 // 3
    dh = Dm // num_heads
    qkv = jnp.einsum("bnd,de->bne", x, wqkv) + bqkv                   # (B, N, 3*Dm)
    qkv = qkv.reshape(B, N, num_heads, 3 * dh).transpose(0, 2, 1, 3)  # b h n (3dh)
    q, k, v = jnp.split(qkv, 3, axis=-1)
    s = jnp.einsum("bhnd,bhmd->bhnm", q, k) / (dh ** 0.5)
    p = jax.nn.softmax(s, axis=-1)
    ctx = jnp.einsum("bhnm,bhmd->bhnd", p, v)
    ctx = ctx.transpose(0, 2, 1, 3).reshape(B, N, Dm)
    return jnp.einsum("bnd,de->bne", ctx, wo) + bo


if __name__ == "__main__":
    # Module hyperparameters (merge_type='concat', bottleneck_ratio=1).
    B, N, d_model, num_heads = 2, 8, 32, 4
    Dm = d_model  # bottleneck_ratio = 1

    key = jax.random.PRNGKey(0)
    kx, kwq, kbq, kwo, kbo = jax.random.split(key, 5)

    x = jax.random.normal(kx, (B, N, d_model), dtype=jnp.float32)
    wqkv = jax.random.normal(kwq, (d_model, 3 * Dm), dtype=jnp.float32) * 0.1
    bqkv = jax.random.normal(kbq, (1, 3 * Dm), dtype=jnp.float32) * 0.1
    wo = jax.random.normal(kwo, (Dm, d_model), dtype=jnp.float32) * 0.1
    bo = jax.random.normal(kbo, (1, d_model), dtype=jnp.float32) * 0.1

    ref = mhsa_reference(x, wqkv, bqkv, wo, bo, num_heads=num_heads)

    # Default path: bf16 MXU operands, f32 accumulation / softmax.
    out_bf16 = jax.block_until_ready(
        mhsa_pallas(x, wqkv, bqkv, wo, bo, num_heads=num_heads))
    assert out_bf16.shape == (B, N, d_model)
    err_bf16 = float(jnp.max(jnp.abs(out_bf16 - ref)))
    assert jnp.allclose(out_bf16, ref, rtol=5e-2, atol=5e-2), err_bf16

    # f32 path for a tight numerical check (only remaining deviation is the
    # approximate EUP reciprocal in the softmax denominator).
    out_f32 = jax.block_until_ready(
        mhsa_pallas(x, wqkv, bqkv, wo, bo, num_heads=num_heads,
                    compute_dtype=jnp.float32))
    err_f32 = float(jnp.max(jnp.abs(out_f32 - ref)))
    assert jnp.allclose(out_f32, ref, rtol=1e-2, atol=1e-2), err_f32

    print("KERNEL_OK")
</pallas_src>

<mosaic_0001>
module attributes {stable_mosaic.version = 11 : i64} {
  func.func @_copy(%arg0: i32, %arg1: memref<8x128xf32, #tpu.memory_space<vmem>>, %arg2: memref<8x128xf32, #tpu.memory_space<vmem>>) attributes {dimension_semantics = [#tpu.dimension_semantics<arbitrary>], iteration_bounds = array<i64: 2>, scalar_prefetch = 0 : i64, scratch_operands = 0 : i64, tpu.core_type = #tpu.core_type<tc>, window_params = [{pipeline_mode = #tpu.pipeline_mode<synchronous>, transform_indices = @transform_0, window_bounds = array<i64: 8, 128>}, {transform_indices = @transform_1, window_bounds = array<i64: 8, 128>}]} {
    %c0 = arith.constant 0 : index
    %c0_0 = arith.constant 0 : index
    %0 = vector.load %arg1[%c0, %c0_0] : memref<8x128xf32, #tpu.memory_space<vmem>>, vector<8x128xf32>
    %c0_1 = arith.constant 0 : index
    %c0_2 = arith.constant 0 : index
    %1 = vector.load %arg2[%c0_1, %c0_2] : memref<8x128xf32, #tpu.memory_space<vmem>>, vector<8x128xf32>
    tpu.vector_store %arg2[%c0_1, %c0_2], %0 {strides = array<i32>} : memref<8x128xf32, #tpu.memory_space<vmem>>, vector<8x128xf32>,
    return
  }
  func.func @transform_0(%arg0: i32) -> (i32, i32) {
    %c0_i32 = arith.constant 0 : i32
    %c0_i32_0 = arith.constant 0 : i32
    %c0_i32_1 = arith.constant 0 : i32
    return %c0_i32, %c0_i32_0 : i32, i32
  }
  func.func @transform_1(%arg0: i32) -> (i32, i32) {
    %c0_i32 = arith.constant 0 : i32
    %c0_i32_0 = arith.constant 0 : i32
    return %arg0, %c0_i32 : i32, i32
  }
}

module attributes {stable_mosaic.version = 11 : i64} {
  func.func @_mhsa_kernel(%arg0: i32, %arg1: memref<1x8x32xf32, #tpu.memory_space<vmem>>, %arg2: memref<32x1536xbf16, #tpu.memory_space<vmem>>, %arg3: memref<1x1536xf32, #tpu.memory_space<vmem>>, %arg4: memref<512x128xbf16, #tpu.memory_space<vmem>>, %arg5: memref<1x128xf32, #tpu.memory_space<vmem>>, %arg6: memref<1x8x128xf32, #tpu.memory_space<vmem>>, %arg7: memref<8x512xbf16, #tpu.memory_space<vmem>>) attributes {dimension_semantics = [#tpu.dimension_semantics<parallel>], iteration_bounds = array<i64: 2>, scalar_prefetch = 0 : i64, scratch_operands = 1 : i64, tpu.core_type = #tpu.core_type<tc>, window_params = [{transform_indices = @transform_0, window_bounds = array<i64: 1, 8, 32>}, {pipeline_mode = #tpu.pipeline_mode<synchronous>, transform_indices = @transform_1, window_bounds = array<i64: 32, 1536>}, {pipeline_mode = #tpu.pipeline_mode<synchronous>, transform_indices = @transform_2, window_bounds = array<i64: 1, 1536>}, {pipeline_mode = #tpu.pipeline_mode<synchronous>, transform_indices = @transform_3, window_bounds = array<i64: 512, 128>}, {pipeline_mode = #tpu.pipeline_mode<synchronous>, transform_indices = @transform_4, window_bounds = array<i64: 1, 128>}, {transform_indices = @transform_5, window_bounds = array<i64: 1, 8, 128>}]} {
    %c0 = arith.constant 0 : index
    %c0_0 = arith.constant 0 : index
    %c0_1 = arith.constant 0 : index
    %0 = vector.load %arg1[%c0, %c0_0, %c0_1] : memref<1x8x32xf32, #tpu.memory_space<vmem>>, vector<1x8x32xf32>
    %1 = vector.shape_cast %0 : vector<1x8x32xf32> to vector<8x32xf32>
    %2 = arith.truncf %1 : vector<8x32xf32> to vector<8x32xbf16>
    %c0_2 = arith.constant 0 : index
    %c0_3 = arith.constant 0 : index
    %3 = vector.load %arg2[%c0_2, %c0_3] : memref<32x1536xbf16, #tpu.memory_space<vmem>>, vector<32x1536xbf16>
    %cst = arith.constant dense<0.000000e+00> : vector<8x1536xf32>
    %4 = tpu.matmul %2, %3, %cst {dimension_numbers = #tpu.dot_dimension_numbers<[1], [0], [0], [1], [0, 0, 1, 1], [], []>} : vector<8x32xbf16>, vector<32x1536xbf16>, vector<8x1536xf32> -> vector<8x1536xf32>
    %c0_4 = arith.constant 0 : index
    %c0_5 = arith.constant 0 : index
    %5 = vector.load %arg3[%c0_4, %c0_5] : memref<1x1536xf32, #tpu.memory_space<vmem>>, vector<1x1536xf32>
    %6 = vector.broadcast %5 : vector<1x1536xf32> to vector<8x1536xf32>
    %7 = arith.addf %4, %6 : vector<8x1536xf32>
    %8 = arith.truncf %7 : vector<8x1536xf32> to vector<8x1536xbf16>
    %9 = vector.shape_cast %8 : vector<8x1536xbf16> to vector<1x8x1536xbf16>
    %10 = vector.extract_strided_slice %9 {offsets = [0, 0, 0], sizes = [1, 8, 128], strides = [1, 1, 1]} : vector<1x8x1536xbf16> to vector<1x8x128xbf16>
    %11 = vector.extract_strided_slice %9 {offsets = [0, 0, 512], sizes = [1, 8, 128], strides = [1, 1, 1]} : vector<1x8x1536xbf16> to vector<1x8x128xbf16>
    %12 = vector.extract_strided_slice %9 {offsets = [0, 0, 1024], sizes = [1, 8, 128], strides = [1, 1, 1]} : vector<1x8x1536xbf16> to vector<1x8x128xbf16>
    "tpu.trace_start"() <{level = 10 : i32, message = "bqd,bkd->bqk"}> : () -> ()
    %cst_6 = arith.constant dense<0.000000e+00> : vector<1x8x8xf32>
    %13 = tpu.matmul %10, %11, %cst_6 {dimension_numbers = #tpu.dot_dimension_numbers<[2], [2], [1], [1], [0, 0, 0, 1, 1, 1], [0], [0]>} : vector<1x8x128xbf16>, vector<1x8x128xbf16>, vector<1x8x8xf32> -> vector<1x8x8xf32>
    "tpu.trace_stop"() : () -> ()
    %cst_7 = arith.constant dense<0xFF800000> : vector<1x8xf32>
    %14 = vector.multi_reduction <maximumf>, %13, %cst_7 [2] : vector<1x8x8xf32> to vector<1x8xf32>
    %15 = vector.shape_cast %14 : vector<1x8xf32> to vector<1x8x1xf32>
    %16 = vector.broadcast %15 : vector<1x8x1xf32> to vector<1x8x8xf32>
    %17 = arith.subf %13, %16 : vector<1x8x8xf32>
    %18 = math.exp %17 : vector<1x8x8xf32>
    %cst_8 = arith.constant dense<0.000000e+00> : vector<1x8xf32>
    %19 = vector.multi_reduction <add>, %18, %cst_8 [2] : vector<1x8x8xf32> to vector<1x8xf32>
    %20 = vector.shape_cast %19 : vector<1x8xf32> to vector<1x8x1xf32>
    %21 = tpu.reciprocal %20 {approx = true} : vector<1x8x1xf32> -> vector<1x8x1xf32>
    %22 = vector.broadcast %21 : vector<1x8x1xf32> to vector<1x8x8xf32>
    %23 = arith.mulf %18, %22 : vector<1x8x8xf32>
    %24 = arith.truncf %23 : vector<1x8x8xf32> to vector<1x8x8xbf16>
    "tpu.trace_start"() <{level = 10 : i32, message = "bqk,bkd->bqd"}> : () -> ()
    %cst_9 = arith.constant dense<0.000000e+00> : vector<1x8x128xf32>
    %25 = tpu.matmul %24, %12, %cst_9 {dimension_numbers = #tpu.dot_dimension_numbers<[2], [1], [1], [2], [0, 0, 0, 1, 1, 2], [0], [0]>} : vector<1x8x8xbf16>, vector<1x8x128xbf16>, vector<1x8x128xf32> -> vector<1x8x128xf32>
    "tpu.trace_stop"() : () -> ()
    %26 = vector.shape_cast %25 : vector<1x8x128xf32> to vector<8x128xf32>
    %27 = arith.truncf %26 : vector<8x128xf32> to vector<8x128xbf16>
    %c0_10 = arith.constant 0 : index
    %c0_11 = arith.constant 0 : index
    %28 = vector.load %arg7[%c0_10, %c0_11] : memref<8x512xbf16, #tpu.memory_space<vmem>>, vector<8x128xbf16>
    tpu.vector_store %arg7[%c0_10, %c0_11], %27 {strides = array<i32>} : memref<8x512xbf16, #tpu.memory_space<vmem>>, vector<8x128xbf16>,
    %29 = vector.extract_strided_slice %9 {offsets = [0, 0, 128], sizes = [1, 8, 128], strides = [1, 1, 1]} : vector<1x8x1536xbf16> to vector<1x8x128xbf16>
    %30 = vector.extract_strided_slice %9 {offsets = [0, 0, 640], sizes = [1, 8, 128], strides = [1, 1, 1]} : vector<1x8x1536xbf16> to vector<1x8x128xbf16>
    %31 = vector.extract_strided_slice %9 {offsets = [0, 0, 1152], sizes = [1, 8, 128], strides = [1, 1, 1]} : vector<1x8x1536xbf16> to vector<1x8x128xbf16>
    "tpu.trace_start"() <{level = 10 : i32, message = "bqd,bkd->bqk"}> : () -> ()
    %cst_12 = arith.constant dense<0.000000e+00> : vector<1x8x8xf32>
    %32 = tpu.matmul %29, %30, %cst_12 {dimension_numbers = #tpu.dot_dimension_numbers<[2], [2], [1], [1], [0, 0, 0, 1, 1, 1], [0], [0]>} : vector<1x8x128xbf16>, vector<1x8x128xbf16>, vector<1x8x8xf32> -> vector<1x8x8xf32>
    "tpu.trace_stop"() : () -> ()
    %cst_13 = arith.constant dense<0xFF800000> : vector<1x8xf32>
    %33 = vector.multi_reduction <maximumf>, %32, %cst_13 [2] : vector<1x8x8xf32> to vector<1x8xf32>
    %34 = vector.shape_cast %33 : vector<1x8xf32> to vector<1x8x1xf32>
    %35 = vector.broadcast %34 : vector<1x8x1xf32> to vector<1x8x8xf32>
    %36 = arith.subf %32, %35 : vector<1x8x8xf32>
    %37 = math.exp %36 : vector<1x8x8xf32>
    %cst_14 = arith.constant dense<0.000000e+00> : vector<1x8xf32>
    %38 = vector.multi_reduction <add>, %37, %cst_14 [2] : vector<1x8x8xf32> to vector<1x8xf32>
    %39 = vector.shape_cast %38 : vector<1x8xf32> to vector<1x8x1xf32>
    %40 = tpu.reciprocal %39 {approx = true} : vector<1x8x1xf32> -> vector<1x8x1xf32>
    %41 = vector.broadcast %40 : vector<1x8x1xf32> to vector<1x8x8xf32>
    %42 = arith.mulf %37, %41 : vector<1x8x8xf32>
    %43 = arith.truncf %42 : vector<1x8x8xf32> to vector<1x8x8xbf16>
    "tpu.trace_start"() <{level = 10 : i32, message = "bqk,bkd->bqd"}> : () -> ()
    %cst_15 = arith.constant dense<0.000000e+00> : vector<1x8x128xf32>
    %44 = tpu.matmul %43, %31, %cst_15 {dimension_numbers = #tpu.dot_dimension_numbers<[2], [1], [1], [2], [0, 0, 0, 1, 1, 2], [0], [0]>} : vector<1x8x8xbf16>, vector<1x8x128xbf16>, vector<1x8x128xf32> -> vector<1x8x128xf32>
    "tpu.trace_stop"() : () -> ()
    %45 = vector.shape_cast %44 : vector<1x8x128xf32> to vector<8x128xf32>
    %46 = arith.truncf %45 : vector<8x128xf32> to vector<8x128xbf16>
    %c0_16 = arith.constant 0 : index
    %c128 = arith.constant 128 : index
    %47 = vector.load %arg7[%c0_16, %c128] : memref<8x512xbf16, #tpu.memory_space<vmem>>, vector<8x128xbf16>
    tpu.vector_store %arg7[%c0_16, %c128], %46 {strides = array<i32>} : memref<8x512xbf16, #tpu.memory_space<vmem>>, vector<8x128xbf16>,
    %48 = vector.extract_strided_slice %9 {offsets = [0, 0, 256], sizes = [1, 8, 128], strides = [1, 1, 1]} : vector<1x8x1536xbf16> to vector<1x8x128xbf16>
    %49 = vector.extract_strided_slice %9 {offsets = [0, 0, 768], sizes = [1, 8, 128], strides = [1, 1, 1]} : vector<1x8x1536xbf16> to vector<1x8x128xbf16>
    %50 = vector.extract_strided_slice %9 {offsets = [0, 0, 1280], sizes = [1, 8, 128], strides = [1, 1, 1]} : vector<1x8x1536xbf16> to vector<1x8x128xbf16>
    "tpu.trace_start"() <{level = 10 : i32, message = "bqd,bkd->bqk"}> : () -> ()
    %cst_17 = arith.constant dense<0.000000e+00> : vector<1x8x8xf32>
    %51 = tpu.matmul %48, %49, %cst_17 {dimension_numbers = #tpu.dot_dimension_numbers<[2], [2], [1], [1], [0, 0, 0, 1, 1, 1], [0], [0]>} : vector<1x8x128xbf16>, vector<1x8x128xbf16>, vector<1x8x8xf32> -> vector<1x8x8xf32>
    "tpu.trace_stop"() : () -> ()
    %cst_18 = arith.constant dense<0xFF800000> : vector<1x8xf32>
    %52 = vector.multi_reduction <maximumf>, %51, %cst_18 [2] : vector<1x8x8xf32> to vector<1x8xf32>
    %53 = vector.shape_cast %52 : vector<1x8xf32> to vector<1x8x1xf32>
    %54 = vector.broadcast %53 : vector<1x8x1xf32> to vector<1x8x8xf32>
    %55 = arith.subf %51, %54 : vector<1x8x8xf32>
    %56 = math.exp %55 : vector<1x8x8xf32>
    %cst_19 = arith.constant dense<0.000000e+00> : vector<1x8xf32>
    %57 = vector.multi_reduction <add>, %56, %cst_19 [2] : vector<1x8x8xf32> to vector<1x8xf32>
    %58 = vector.shape_cast %57 : vector<1x8xf32> to vector<1x8x1xf32>
    %59 = tpu.reciprocal %58 {approx = true} : vector<1x8x1xf32> -> vector<1x8x1xf32>
    %60 = vector.broadcast %59 : vector<1x8x1xf32> to vector<1x8x8xf32>
    %61 = arith.mulf %56, %60 : vector<1x8x8xf32>
    %62 = arith.truncf %61 : vector<1x8x8xf32> to vector<1x8x8xbf16>
    "tpu.trace_start"() <{level = 10 : i32, message = "bqk,bkd->bqd"}> : () -> ()
    %cst_20 = arith.constant dense<0.000000e+00> : vector<1x8x128xf32>
    %63 = tpu.matmul %62, %50, %cst_20 {dimension_numbers = #tpu.dot_dimension_numbers<[2], [1], [1], [2], [0, 0, 0, 1, 1, 2], [0], [0]>} : vector<1x8x8xbf16>, vector<1x8x128xbf16>, vector<1x8x128xf32> -> vector<1x8x128xf32>
    "tpu.trace_stop"() : () -> ()
    %64 = vector.shape_cast %63 : vector<1x8x128xf32> to vector<8x128xf32>
    %65 = arith.truncf %64 : vector<8x128xf32> to vector<8x128xbf16>
    %c0_21 = arith.constant 0 : index
    %c256 = arith.constant 256 : index
    %66 = vector.load %arg7[%c0_21, %c256] : memref<8x512xbf16, #tpu.memory_space<vmem>>, vector<8x128xbf16>
    tpu.vector_store %arg7[%c0_21, %c256], %65 {strides = array<i32>} : memref<8x512xbf16, #tpu.memory_space<vmem>>, vector<8x128xbf16>,
    %67 = vector.extract_strided_slice %9 {offsets = [0, 0, 384], sizes = [1, 8, 128], strides = [1, 1, 1]} : vector<1x8x1536xbf16> to vector<1x8x128xbf16>
    %68 = vector.extract_strided_slice %9 {offsets = [0, 0, 896], sizes = [1, 8, 128], strides = [1, 1, 1]} : vector<1x8x1536xbf16> to vector<1x8x128xbf16>
    %69 = vector.extract_strided_slice %9 {offsets = [0, 0, 1408], sizes = [1, 8, 128], strides = [1, 1, 1]} : vector<1x8x1536xbf16> to vector<1x8x128xbf16>
    "tpu.trace_start"() <{level = 10 : i32, message = "bqd,bkd->bqk"}> : () -> ()
    %cst_22 = arith.constant dense<0.000000e+00> : vector<1x8x8xf32>
    %70 = tpu.matmul %67, %68, %cst_22 {dimension_numbers = #tpu.dot_dimension_numbers<[2], [2], [1], [1], [0, 0, 0, 1, 1, 1], [0], [0]>} : vector<1x8x128xbf16>, vector<1x8x128xbf16>, vector<1x8x8xf32> -> vector<1x8x8xf32>
    "tpu.trace_stop"() : () -> ()
    %cst_23 = arith.constant dense<0xFF800000> : vector<1x8xf32>
    %71 = vector.multi_reduction <maximumf>, %70, %cst_23 [2] : vector<1x8x8xf32> to vector<1x8xf32>
    %72 = vector.shape_cast %71 : vector<1x8xf32> to vector<1x8x1xf32>
    %73 = vector.broadcast %72 : vector<1x8x1xf32> to vector<1x8x8xf32>
    %74 = arith.subf %70, %73 : vector<1x8x8xf32>
    %75 = math.exp %74 : vector<1x8x8xf32>
    %cst_24 = arith.constant dense<0.000000e+00> : vector<1x8xf32>
    %76 = vector.multi_reduction <add>, %75, %cst_24 [2] : vector<1x8x8xf32> to vector<1x8xf32>
    %77 = vector.shape_cast %76 : vector<1x8xf32> to vector<1x8x1xf32>
    %78 = tpu.reciprocal %77 {approx = true} : vector<1x8x1xf32> -> vector<1x8x1xf32>
    %79 = vector.broadcast %78 : vector<1x8x1xf32> to vector<1x8x8xf32>
    %80 = arith.mulf %75, %79 : vector<1x8x8xf32>
    %81 = arith.truncf %80 : vector<1x8x8xf32> to vector<1x8x8xbf16>
    "tpu.trace_start"() <{level = 10 : i32, message = "bqk,bkd->bqd"}> : () -> ()
    %cst_25 = arith.constant dense<0.000000e+00> : vector<1x8x128xf32>
    %82 = tpu.matmul %81, %69, %cst_25 {dimension_numbers = #tpu.dot_dimension_numbers<[2], [1], [1], [2], [0, 0, 0, 1, 1, 2], [0], [0]>} : vector<1x8x8xbf16>, vector<1x8x128xbf16>, vector<1x8x128xf32> -> vector<1x8x128xf32>
    "tpu.trace_stop"() : () -> ()
    %83 = vector.shape_cast %82 : vector<1x8x128xf32> to vector<8x128xf32>
    %84 = arith.truncf %83 : vector<8x128xf32> to vector<8x128xbf16>
    %c0_26 = arith.constant 0 : index
    %c384 = arith.constant 384 : index
    %85 = vector.load %arg7[%c0_26, %c384] : memref<8x512xbf16, #tpu.memory_space<vmem>>, vector<8x128xbf16>
    tpu.vector_store %arg7[%c0_26, %c384], %84 {strides = array<i32>} : memref<8x512xbf16, #tpu.memory_space<vmem>>, vector<8x128xbf16>,
    %c0_27 = arith.constant 0 : index
    %c0_28 = arith.constant 0 : index
    %86 = vector.load %arg7[%c0_27, %c0_28] : memref<8x512xbf16, #tpu.memory_space<vmem>>, vector<8x512xbf16>
    %c0_29 = arith.constant 0 : index
    %c0_30 = arith.constant 0 : index
    %87 = vector.load %arg4[%c0_29, %c0_30] : memref<512x128xbf16, #tpu.memory_space<vmem>>, vector<512x128xbf16>
    %cst_31 = arith.constant dense<0.000000e+00> : vector<8x128xf32>
    %88 = tpu.matmul %86, %87, %cst_31 {dimension_numbers = #tpu.dot_dimension_numbers<[1], [0], [0], [1], [0, 0, 1, 1], [], []>} : vector<8x512xbf16>, vector<512x128xbf16>, vector<8x128xf32> -> vector<8x128xf32>
    %c0_32 = arith.constant 0 : index
    %c0_33 = arith.constant 0 : index
    %89 = vector.load %arg5[%c0_32, %c0_33] : memref<1x128xf32, #tpu.memory_space<vmem>>, vector<1x128xf32>
    %90 = vector.broadcast %89 : vector<1x128xf32> to vector<8x128xf32>
    %91 = arith.addf %88, %90 : vector<8x128xf32>
    %92 = vector.shape_cast %91 : vector<8x128xf32> to vector<1x8x128xf32>
    %c0_34 = arith.constant 0 : index
    %c0_35 = arith.constant 0 : index
    %c0_36 = arith.constant 0 : index
    %93 = vector.load %arg6[%c0_34, %c0_35, %c0_36] : memref<1x8x128xf32, #tpu.memory_space<vmem>>, vector<1x8x128xf32>
    tpu.vector_store %arg6[%c0_34, %c0_35, %c0_36], %92 {strides = array<i32>} : memref<1x8x128xf32, #tpu.memory_space<vmem>>, vector<1x8x128xf32>,
    return
  }
  func.func @transform_0(%arg0: i32) -> (i32, i32, i32) {
    %c0_i32 = arith.constant 0 : i32
    %c0_i32_0 = arith.constant 0 : i32
    %c0_i32_1 = arith.constant 0 : i32
    return %arg0, %c0_i32, %c0_i32_0 : i32, i32, i32
  }
  func.func @transform_1(%arg0: i32) -> (i32, i32) {
    %c0_i32 = arith.constant 0 : i32
    %c0_i32_0 = arith.constant 0 : i32
    %c0_i32_1 = arith.constant 0 : i32
    return %c0_i32, %c0_i32_0 : i32, i32
  }
  func.func @transform_2(%arg0: i32) -> (i32, i32) {
    %c0_i32 = arith.constant 0 : i32
    %c0_i32_0 = arith.constant 0 : i32
    %c0_i32_1 = arith.constant 0 : i32
    return %c0_i32, %c0_i32_0 : i32, i32
  }
  func.func @transform_3(%arg0: i32) -> (i32, i32) {
    %c0_i32 = arith.constant 0 : i32
    %c0_i32_0 = arith.constant 0 : i32
    %c0_i32_1 = arith.constant 0 : i32
    return %c0_i32, %c0_i32_0 : i32, i32
  }
  func.func @transform_4(%arg0: i32) -> (i32, i32) {
    %c0_i32 = arith.constant 0 : i32
    %c0_i32_0 = arith.constant 0 : i32
    %c0_i32_1 = arith.constant 0 : i32
    return %c0_i32, %c0_i32_0 : i32, i32
  }
  func.func @transform_5(%arg0: i32) -> (i32, i32, i32) {
    %c0_i32 = arith.constant 0 : i32
    %c0_i32_0 = arith.constant 0 : i32
    %c0_i32_1 = arith.constant 0 : i32
    return %arg0, %c0_i32, %c0_i32_0 : i32, i32, i32
  }
}

</mosaic_0001>

<bundles_post_ra>
// kernel: tpu_custom_call.1
= control target key start
LH: loop header
LB: loop body
LE: loop exit
PB: predicated region body
PF: predicated region fallthrough
CT: control target
= control target key end

     0   :  { %6 = vsyncpa [#allocation3], 0  ;;  %s481_s0 = inlined_call_operand.hbm [shape: f32[8,128], index: 0, kind: input, shape index: {}]   ;;  %s482_s1 = inlined_call_operand.hbm [shape: f32[16,128], index: 1, kind: output, shape index: {}]  }
   0x1   :  { %7 = vsyncpa [#allocation4], 0 }
   0x2   :  { %9 = vsyncpa [#allocation4 + $0x1], 0  ;;  %s351_s6 = smov 0   ;;  %s353_s7 = smov 0  }
   0x3   :  { %s355_s8 = smov 0   ;;  %s357_s9 = smov 0  }
   0x4 LB: > { %s372_s10 = sadd.s32 4294967295, %s337_s9   ;;  %s183_s11 = sadd.s32 4294967294, %s337_s9   ;;  %s337_s9 = sphi %s357_s9, %s498_s9   ;;  %s333_s8 = sphi %s355_s8, %s497_s8   ;;  %s329_s7 = sphi %s353_s7, %s496_s7   ;;  %s325_s6 = sphi %s351_s6, %s495_s6  }
   0x5   : > { %s376_s12 = sadd.s32 1, %s337_s9   ;;  %s43_s13 = sadd.s32 1, %s333_s8 }
   0x6   : > { %s40_s14 = ssub.s32 %s337_s9, %s376_s12  ;;  %p53_p0 = scmp.ne.s32.totalorder %s333_s8, %s329_s7 }
   0x7   : > { %p41_p1 = scmp.eq.s32.totalorder %s40_s14, 0  ;;  %p54_p2 = scmp.eq.s32.totalorder %s372_s10, 1 }
   0x8   : > { %p59_p3 = scmp.ne.s32.totalorder %s329_s7, %s325_s6  ;;  %p60_p4 = scmp.eq.s32.totalorder %s183_s11, 1 }
   0x9   : > { %s387_s15 = scalar_select %p41_p1, %s333_s8, %s43_s13  }
   0xa   : > { %p389_p5 = por %p54_p2, %p53_p0  ;;  %p393_p6 = por %p60_p4, %p59_p3 }
   0xb   : > { %p184_p7 = scmp.ge.s32.totalorder %s337_s9, 1  ;;  %p67_p8 = scmp.lt.s32.totalorder %s337_s9, 3 }
   0xc   : > { %s486_s16 = scalar_select %p389_p5, 1, 0 }
   0xd   : > { %s487_s17 = scalar_select %p393_p6, 1, 0 }
   0xe   : > { %p483_p9 = scmp.eq.s32.totalorder %s372_s10, 0  ;;  %p400_p10 = pnand %p184_p7, %p67_p8 }
   0xf   : > { %s339_s19 = smov [#allocation2]   ;;  %s243_s24 = scalar_lea.hbm %s481_s0, 128 }
  0x10   : > { %s488_s18 = scalar_select %p400_p10, 1, 0 }
  0x11   : > { %s80_s20 = sshll.u32 %s339_s19, 4  ;;  %p199_p11 = pneg %p400_p10  ;;  %s81_s20 = int_to_ptr.vmem [resolvable:$true] %s80_s20 }
  0x12   : > { %p244_p13 = scmp.ne.s32.totalorder %s481_s0, %s243_s24  ;;  %p250_p3 = scmp.lt.u32.totalorder %s243_s24, %s481_s0 }
  0x13   : > { %p408_p12 = pnand %p483_p9, %p199_p11 }
  0x15   : > { %p245_p0 = pneg %p408_p12 }
  0x17   : > { %p246_p1 = pnand %p245_p0, %p244_p13 }
  0x19   : > { %p247_p2 = pneg %p246_p1 }
  0x1b   : > { %p252_p4 = pnand %p250_p3, %p247_p2 }
  0x1d   : > { %255 = shalt.err (!%p252_p4)
}
  0x1e   : > { %s256_s29 = scalar_lea.vmem %s81_s20, 128  ;;  %p264_p9 = scmp.lt.s32.totalorder %s81_s20, %s81_s20 }
  0x1f   : > { %p257_p7 = scmp.ne.s32.totalorder %s81_s20, %s256_s29  ;;  %p265_p6 = scmp.lt.s32.totalorder %s256_s29, %s256_s29 }
  0x21   : > { %p259_p8 = pnand %p257_p7, %p245_p0  ;;  %p266_p5 = por %p265_p6, %p264_p9 }
  0x23   : > { %p260_p11 = pneg %p259_p8 }
  0x25   : > { %p267_p10 = pnand %p266_p5, %p260_p11 }
  0x27   : > { %270 = shalt.err (!%p267_p10)
}
  0x28   : > { %202 = dma.hbm_to_vmem [thread:$0]  (!%p408_p12), %s481_s0, 128, %s81_s20, [#allocation3]  }
  0x29   : > { %p490_p13 = scmp.ne.s32.totalorder %s488_s18, 0 }
  0x2a   : > { %p491_p1 = scmp.eq.s32.totalorder (!%p490_p13), %s372_s10, 0 }
  0x2b   : > { %93 = sbr.rel (%p490_p13) target bundleno = 77 (0x4d), region = 24 }
  0x32   : > { %316 = dma.done.wait (%p491_p1), [#allocation3], 128   ;;  %p492_p0 = pmov %p491_p1 }
  0x33   : > { %s105_s3 = sand.u32 1, %s329_s7   ;;  %s190_s13 = sshll.u32 %s372_s10, 7  ;;  %v108_v0 = vld [vmem:[#allocation2] sm:$0xff] }
  0x34   : > { %318 = vsyncadd (%p492_p0), [#allocation3], 4294967168  ;;  %s188_s4 = sshll.u32 %s105_s3, 3  ;;  %s441_s18 = scalar_lea.hbm %s482_s1, %s190_s13 }
  0x35   : > { %s107_s5 = scalar_lea.vmem [#allocation5], %s188_s4  ;;  %s111_s20 = scalar_lea.sflag [#allocation4], %s105_s3 }
  0x36   : > { %s124_s11 = sshll.u32 %s107_s5, 4  ;;  %109 = vst [vmem:[%s107_s5] sm:$0xff] %v108_v0  ;;  %p493_p6 = scmp.ne.s32.totalorder %s486_s16, 0  ;;  %s436_s11 = int_to_ptr.vmem [resolvable:$true] %s124_s11 }
  0x37   : > { %s271_s21 = scalar_lea.vmem %s436_s11, 128  ;;  %s340_s22 = smov [#allocation5]  }
  0x38   : > { %p272_p5 = scmp.ne.s32.totalorder %s436_s11, %s271_s21  ;;  %s275_s10 = sshll.u32 %s340_s22, 4  ;;  %s276_s10 = int_to_ptr.vmem [resolvable:$false] %s275_s10 }
  0x39   : > { %s277_s23 = scalar_lea.vmem %s276_s10, 256  ;;  %p278_p12 = scmp.lt.s32.totalorder %s436_s11, %s276_s10 }
  0x3a   : > { %p273_p9 = pnand %p272_p5, %p493_p6  ;;  %p279_p2 = scmp.lt.s32.totalorder %s277_s23, %s271_s21 }
  0x3c   : > { %p274_p10 = pneg %p273_p9  ;;  %p280_p3 = por %p279_p2, %p278_p12 }
  0x3e   : > { %p281_p4 = pnand %p280_p3, %p274_p10 }
  0x40   : > { %284 = shalt.err (!%p281_p4)
}
  0x41   : > { %s285_s24 = scalar_lea.hbm %s441_s18, 128  ;;  %s289_s27 = scalar_lea.hbm %s482_s1, 256 }
  0x42   : > { %p286_p7 = scmp.ne.s32.totalorder %s441_s18, %s285_s24  ;;  %p290_p13 = scmp.lt.u32.totalorder %s441_s18, %s482_s1 }
  0x43   : > { %p291_p1 = scmp.lt.u32.totalorder %s289_s27, %s285_s24  ;;  %p293_p5 = scmp.lt.u32.totalorder %s285_s24, %s441_s18 }
  0x44   : > { %p287_p8 = pnand %p286_p7, %p493_p6 }
  0x45   : > { %p292_p0 = por %p291_p1, %p290_p13 }
  0x46   : > { %p288_p11 = pneg %p287_p8 }
  0x47   : > { %p294_p9 = por %p293_p5, %p292_p0 }
  0x49   : > { %p295_p10 = pnand %p294_p9, %p288_p11 }
  0x4b   : > { %298 = shalt.err (!%p295_p10)
}
  0x4c   : > { %197 = dma.vmem_to_hbm [thread:$0]  (%p493_p6), %s436_s11, 128, %s441_s18, %s111_s20  }
  0x4d PF: > { %p209_p12 = scmp.ge.s32.totalorder %s337_s9, 2  ;;  %s136_s30 = sand.u32 1, %s325_s6  }
  0x4e   : > { %p494_p2 = scmp.ne.s32.totalorder %s487_s17, 0  ;;  %s137_s2 = scalar_lea.sflag [#allocation4], %s136_s30 }
  0x50   : > { %p204_p3 = pnand %p209_p12, %p494_p2 }
  0x52   : > { %320 = dma.done.wait (!%p204_p3), %s137_s2, 128  }
  0x53   : > { %322 = vsyncadd (!%p204_p3), %s137_s2, 4294967168  ;;  %p12_p4 = scmp.ge.s32.totalorder %s376_s12, 4   ;;  %s495_s6 = smov %s329_s7 }
  0x54   : > { %s496_s7 = smov %s333_s8  ;;  %s497_s8 = smov %s387_s15 }
  0x55   : > { %s498_s9 = smov %s376_s12  ;;  %14 = sbr.rel (!%p12_p4) target bundleno = 4 (0x4), region = 61 }
  0x5c   :  { %142 = vsyncpa [#allocation3], 1 }
  0x5d   :  { %144 = vsyncpa [#allocation3 + $0x1], 1 }
  0x5e   :  { %145 = vsyncpa [#allocation4], 1 }
  0x5f   :  { %147 = vsyncpa [#allocation4 + $0x1], 1 }

// kernel: tpu_custom_call.1
= control target key start
LH: loop header
LB: loop body
LE: loop exit
PB: predicated region body
PF: predicated region fallthrough
CT: control target
= control target key end

     0   :  { %10 = vsyncpa [#allocation4], 0  ;;  %s2569_s0 = inlined_call_operand.hbm [shape: f32[2,8,32], index: 0, kind: input, shape index: {}]   ;;  %s2570_s1 = inlined_call_operand.hbm [shape: bf16[32,1536], index: 1, kind: input, shape index: {}]   ;;  %s2571_s2 = inlined_call_operand.hbm [shape: f32[1,1536], index: 2, kind: input, shape index: {}]   ;;  %s2572_s3 = inlined_call_operand.hbm [shape: bf16[512,128], index: 3, kind: input, shape index: {}]   ;;  %s2573_s4 = inlined_call_operand.vmem [shape: f32[1,128], index: 4, kind: input, shape index: {}]   ;;  %s2574_s5 = inlined_call_operand.hbm [shape: f32[2,8,128], index: 5, kind: output, shape index: {}]  }
   0x1   :  { %12 = vsyncpa [#allocation4 + $0x1], 0 }
   0x2   :  { %13 = vsyncpa [#allocation7], 0 }
   0x3   :  { %14 = vsyncpa [#allocation10], 0 }
   0x4   :  { %15 = vsyncpa [#allocation5], 0 }
   0x5   :  { %17 = vsyncpa [#allocation5 + $0x1], 0  ;;  %s2231_s18 = smov 0   ;;  %s2233_s19 = smov 0  }
   0x6   :  { %s2235_s20 = smov 0   ;;  %s2237_s21 = smov 0  }
   0x7 LB: > { %s2252_s22 = sadd.s32 4294967295, %s2187_s21   ;;  %s1630_s23 = sadd.s32 4294967294, %s2187_s21   ;;  %s2187_s21 = sphi %s2237_s21, %s2597_s21   ;;  %s2183_s20 = sphi %s2235_s20, %s2596_s20   ;;  %s2179_s19 = sphi %s2233_s19, %s2595_s19   ;;  %s2175_s18 = sphi %s2231_s18, %s2594_s18  }
   0x8   : > { %p43_p0 = scmp.ne.s32.totalorder %s2179_s19, %s2175_s18  ;;  %p2575_p1 = scmp.eq.s32.totalorder %s2252_s22, 0 }
   0x9   : > { %p157_p3 = scmp.eq.s32.totalorder %s1630_s23, 1  ;;  %p1631_p5 = scmp.ge.s32.totalorder %s2187_s21, 1 }
   0xa   : > { %p2261_p4 = por %p2575_p1, %p43_p0  ;;  %p164_p7 = scmp.lt.s32.totalorder %s2187_s21, 3 }
   0xb   : > { %p2266_p6 = por %p157_p3, %p43_p0  ;;  %s2189_s27 = smov [#allocation6]  }
   0xc   : > { %s2578_s24 = scalar_select %p2261_p4, 1, 0 }
   0xd   : > { %s2579_s25 = scalar_select %p2266_p6, 1, 0 }
   0xe   : > { %p2271_p8 = pnand %p1631_p5, %p164_p7  ;;  %s176_s28 = sshll.u32 %s2189_s27, 4  ;;  %s2275_s28 = int_to_ptr.vmem [resolvable:$true] %s176_s28 }
   0xf   : > { %s2190_s30 = smov [#allocation8]   ;;  %s2191_s7 = smov [#allocation9]  }
  0x10   : > { %s2580_s26 = scalar_select %p2271_p8, 1, 0 }
  0x11   : > { %p1843_p9 = pneg %p2271_p8  ;;  %s190_s6 = sshll.u32 %s2190_s30, 4  ;;  %s2286_s6 = int_to_ptr.vmem [resolvable:$true] %s190_s6 }
  0x12   : > { %s2288_s8 = sshll.u32 %s2191_s7, 4  ;;  %s1999_s11 = scalar_lea.hbm %s2570_s1, 3072  ;;  %s201_s8 = int_to_ptr.vmem [resolvable:$true] %s2288_s8 }
  0x13   : > { %p2282_p11 = pnand %p1843_p9, %p2575_p1  ;;  %p2000_p12 = scmp.ne.s32.totalorder %s2570_s1, %s1999_s11 }
  0x14   : > { %p2006_p5 = scmp.lt.u32.totalorder %s1999_s11, %s2570_s1 }
  0x15   : > { %p2298_p13 = pneg %p2282_p11 }
  0x17   : > { %p2002_p0 = pnand %p2298_p13, %p2000_p12 }
  0x19   : > { %p2003_p3 = pneg %p2002_p0 }
  0x1b   : > { %p2008_p7 = pnand %p2006_p5, %p2003_p3 }
  0x1d   : > { %2011 = shalt.err (!%p2008_p7)
}
  0x1e   : > { %s2012_s17 = scalar_lea.vmem %s2275_s28, 3072  ;;  %p2020_p2 = scmp.lt.s32.totalorder %s2275_s28, %s2275_s28 }
  0x1f   : > { %p2013_p9 = scmp.ne.s32.totalorder %s2275_s28, %s2012_s17  ;;  %p2021_p6 = scmp.lt.s32.totalorder %s2012_s17, %s2012_s17 }
  0x21   : > { %p2015_p10 = pnand %p2013_p9, %p2298_p13  ;;  %p2022_p12 = por %p2021_p6, %p2020_p2 }
  0x23   : > { %p2016_p1 = pneg %p2015_p10 }
  0x25   : > { %p2023_p0 = pnand %p2022_p12, %p2016_p1 }
  0x27   : > { %2026 = shalt.err (!%p2023_p0)
}
  0x28   : > { %s2192_s23 = smov 768   ;;  %s2193_s27 = smov 48  }
  0x29   : > { %1846 = dma.hbm_to_vmem [thread:$0]  (!%p2282_p11), %s2570_s1, 3072, %s2275_s28, [#allocation7], %s2192_s23, %s2192_s23, %s2193_s27  }
  0x2a   : > { %s2027_s11 = scalar_lea.hbm %s2571_s2, 192 }
  0x2b   : > { %p2028_p2 = scmp.ne.s32.totalorder %s2571_s2, %s2027_s11  ;;  %p2034_p10 = scmp.lt.u32.totalorder %s2027_s11, %s2571_s2 }
  0x2d   : > { %p2030_p1 = pnand %p2028_p2, %p2298_p13 }
  0x2f   : > { %p2031_p6 = pneg %p2030_p1 }
  0x31   : > { %p2036_p3 = pnand %p2034_p10, %p2031_p6 }
  0x33   : > { %2039 = shalt.err (!%p2036_p3)
}
  0x34   : > { %s2040_s28 = scalar_lea.vmem %s2286_s6, 192  ;;  %p2048_p12 = scmp.lt.s32.totalorder %s2286_s6, %s2286_s6 }
  0x35   : > { %p2041_p5 = scmp.ne.s32.totalorder %s2286_s6, %s2040_s28  ;;  %p2049_p0 = scmp.lt.s32.totalorder %s2040_s28, %s2040_s28 }
  0x37   : > { %p2043_p7 = pnand %p2041_p5, %p2298_p13  ;;  %p2050_p2 = por %p2049_p0, %p2048_p12 }
  0x39   : > { %p2044_p9 = pneg %p2043_p7 }
  0x3b   : > { %p2051_p1 = pnand %p2050_p2, %p2044_p9 }
  0x3d   : > { %2054 = shalt.err (!%p2051_p1)
}
  0x3e   : > { %1849 = dma.hbm_to_vmem [thread:$0]  (!%p2282_p11), %s2571_s2, 192, %s2286_s6, [#allocation7]  }
  0x3f   : > { %s2055_s7 = scalar_lea.hbm %s2572_s3, 4096 }
  0x40   : > { %p2056_p6 = scmp.ne.s32.totalorder %s2572_s3, %s2055_s7  ;;  %p2062_p5 = scmp.lt.u32.totalorder %s2055_s7, %s2572_s3 }
  0x42   : > { %p2058_p10 = pnand %p2056_p6, %p2298_p13 }
  0x44   : > { %p2059_p3 = pneg %p2058_p10 }
  0x46   : > { %p2064_p7 = pnand %p2062_p5, %p2059_p3 }
  0x48   : > { %2067 = shalt.err (!%p2064_p7)
}
  0x49   : > { %s2068_s13 = scalar_lea.vmem %s201_s8, 4096  ;;  %p2076_p2 = scmp.lt.s32.totalorder %s201_s8, %s201_s8 }
  0x4a   : > { %p2069_p9 = scmp.ne.s32.totalorder %s201_s8, %s2068_s13  ;;  %p2077_p1 = scmp.lt.s32.totalorder %s2068_s13, %s2068_s13 }
  0x4c   : > { %p2071_p12 = pnand %p2069_p9, %p2298_p13  ;;  %p2078_p4 = por %p2077_p1, %p2076_p2 }
  0x4e   : > { %p2072_p0 = pneg %p2071_p12 }
  0x50   : > { %p2079_p8 = pnand %p2078_p4, %p2072_p0 }
  0x52   : > { %2082 = shalt.err (!%p2079_p8)
}
  0x53   : > { %s2194_s6 = smov 64   ;;  %s2195_s14 = smov 4  }
  0x54   : > { %1852 = dma.hbm_to_vmem [thread:$0]  (!%p2282_p11), %s2572_s3, 4096, %s201_s8, [#allocation10], %s2194_s6, %s2194_s6, %s2195_s14  }
  0x55   : > { %s2362_s28 = sadd.s32 1, %s2187_s21   ;;  %s30_s23 = sadd.s32 1, %s2183_s20 }
  0x56   : > { %s27_s17 = ssub.s32 %s2187_s21, %s2362_s28  ;;  %p37_p8 = scmp.ne.s32.totalorder %s2183_s20, %s2179_s19 }
  0x57   : > { %p28_p4 = scmp.eq.s32.totalorder %s27_s17, 0  ;;  %p38_p13 = scmp.eq.s32.totalorder %s2187_s21, 0 }
  0x58   : > { %p1864_p6 = scmp.lt.s32.totalorder %s2187_s21, 2  ;;  %p2583_p3 = scmp.eq.s32.totalorder %s2252_s22, 1 }
  0x59   : > { %s2372_s27 = scalar_select %p28_p4, %s2183_s20, %s30_s23  }
  0x5a   : > { %p39_p10 = por %p38_p13, %p37_p8  ;;  %p2376_p5 = por %p2583_p3, %p37_p8 }
  0x5b   : > { %s217_s29 = sand.u32 1, %s2183_s20   ;;  %s1637_s7 = sshll.u32 %s2187_s21, 7 }
  0x5c   : > { %s1636_s8 = sshll.u32 %s217_s29, 3  ;;  %s2385_s11 = scalar_lea.hbm %s2569_s0, %s1637_s7 }
  0x5d   : > { %s221_s12 = scalar_lea.vmem [#allocation3], %s1636_s8  ;;  %p2387_p11 = pnand %p1864_p6, %p39_p10 }
  0x5e   : > { %s228_s13 = sshll.u32 %s221_s12, 4  ;;  %s218_s14 = scalar_lea.sflag [#allocation4], %s217_s29  ;;  %s2391_s13 = int_to_ptr.vmem [resolvable:$true] %s228_s13 }
  0x5f   : > { %s2083_s15 = scalar_lea.hbm %s2385_s11, 128  ;;  %p2085_p9 = pneg %p2387_p11 }
  0x60   : > { %p2084_p7 = scmp.ne.s32.totalorder %s2385_s11, %s2083_s15  ;;  %s2088_s23 = scalar_lea.hbm %s2569_s0, 256 }
  0x61   : > { %p2089_p2 = scmp.lt.u32.totalorder %s2385_s11, %s2569_s0  ;;  %p2090_p1 = scmp.lt.u32.totalorder %s2088_s23, %s2083_s15 }
  0x62   : > { %p2086_p12 = pnand %p2085_p9, %p2084_p7  ;;  %p2092_p8 = scmp.lt.u32.totalorder %s2083_s15, %s2385_s11 }
  0x63   : > { %p2091_p4 = por %p2090_p1, %p2089_p2 }
  0x64   : > { %p2087_p0 = pneg %p2086_p12 }
  0x65   : > { %p2093_p13 = por %p2092_p8, %p2091_p4 }
  0x67   : > { %p2094_p6 = pnand %p2093_p13, %p2087_p0 }
  0x69   : > { %2097 = shalt.err (!%p2094_p6)
}
  0x6a   : > { %s2098_s29 = scalar_lea.vmem %s2391_s13, 128  ;;  %s2196_s9 = smov [#allocation3]  }
  0x6b   : > { %p2099_p10 = scmp.ne.s32.totalorder %s2391_s13, %s2098_s29  ;;  %s2103_s10 = sshll.u32 %s2196_s9, 4  ;;  %s2104_s10 = int_to_ptr.vmem [resolvable:$false] %s2103_s10 }
  0x6c   : > { %s2105_s12 = scalar_lea.vmem %s2104_s10, 256  ;;  %p2106_p12 = scmp.lt.s32.totalorder %s2391_s13, %s2104_s10 }
  0x6d   : > { %p2101_p3 = pnand %p2099_p10, %p2085_p9  ;;  %p2107_p2 = scmp.lt.s32.totalorder %s2105_s12, %s2098_s29 }
  0x6f   : > { %p2102_p7 = pneg %p2101_p3  ;;  %p2108_p1 = por %p2107_p2, %p2106_p12 }
  0x71   : > { %p2109_p4 = pnand %p2108_p1, %p2102_p7 }
  0x73   : > { %2112 = shalt.err (!%p2109_p4)
}
  0x74   : > { %1856 = dma.hbm_to_vmem [thread:$0]  (!%p2387_p11), %s2385_s11, 128, %s2391_s13, %s218_s14  }
  0x75   : > { %p2586_p0 = scmp.ne.s32.totalorder %s2580_s26, 0 }
  0x76   : > { %s2421_s15 = sand.u32 (!%p2586_p0), 1, %s2179_s19   ;;  %p2587_p9 = scmp.ne.s32.totalorder (!%p2586_p0), %s2578_s24, 0 }
  0x77   : > { %237 = sbr.rel (%p2586_p0) target bundleno = 1383 (0x567), region = 40  ;;  %s1639_s16 = sshll.u32 (!%p2586_p0), %s2421_s15, 3 }
  0x78   : > { %s240_s17 = scalar_lea.sflag (!%p2586_p0), [#allocation4], %s2421_s15  ;;  %s243_s23 = scalar_lea.vmem (!%p2586_p0), [#allocation3], %s1639_s16 }
  0x7e   : > { %2158 = dma.done.wait (%p2587_p9), %s240_s17, 128  }
  0x7f   : > { %2160 = vsyncadd (%p2587_p9), %s240_s17, 4294967168  ;;  %p2588_p11 = scmp.eq.s32.totalorder %s2252_s22, 0 }
  0x81   : > { %2162 = dma.done.wait (%p2588_p11), [#allocation7], 3264   ;;  %p2589_p8 = pmov %p2588_p11 }
  0x83   : > { %2164 = vsyncadd (%p2589_p8), [#allocation7], 4294964032  ;;  %p2590_p13 = pmov %p2589_p8 }
  0x84   : > { %p2591_p6 = pmov %p2589_p8 }
  0x85   : > { %2166 = dma.done.wait (%p2590_p13), [#allocation10], 4096  }
  0x86   : > { %2168 = vsyncadd (%p2591_p6), [#allocation10], 4294963200  ;;  %v2197_v0 = vmov 0   ;;  %v1911_v1 = vld [vmem:[#allocation6 + $0x4] ss:$48 sps:$4 sm:$0xff]   ;;  %vm493_vm0 = vcmask 261120   ;;  %v313_v28 = vlaneseq }
  0x87   : > { %529 = vmatprep.mubr.bf16.mxu0 %v2197_v0  ;;  %570 = vmatprep.mubr.bf16.mxu1 %v2197_v0  ;;  %v1913_v2 = vld [vmem:[#allocation6] ss:$48 sps:$4 sm:$0xff]   ;;  %v1914_v3 = vld [vmem:[#allocation6 + $0x64] ss:$48 sps:$4 sm:$0xff]   ;;  %v1923_v9 = vld [vmem:[#allocation6 + $0xc] ss:$48 sps:$4 sm:$0xff]  }
  0x88   : > { %497 = vmatprep.subr.bf16.mxu0 %v1911_v1  ;;  %v1916_v4 = vld [vmem:[#allocation6 + $0x60] ss:$48 sps:$4 sm:$0xff]   ;;  %v1919_v6 = vld [vmem:[#allocation6 + $0x14] ss:$48 sps:$4 sm:$0xff]   ;;  %v1925_v10 = vld [vmem:[#allocation6 + $0x8] ss:$48 sps:$4 sm:$0xff]   ;;  %538 = vmatprep.subr.bf16.mxu1 %v1923_v9 }
  0x89   : > { %498 = vmatpush1.bf16.msra.mxu0 %v1913_v2  ;;  %v283_v5 = vld [vmem:[%s243_s23] sm:$0xff]  ;;  %539 = vmatpush1.bf16.msra.mxu1 %v1925_v10  ;;  %v2198_v23 = vmov 0.0   ;;  %vm2199_vm1 = vmmov 0   ;;  %v2451_v29 = vshrl.u32 %v313_v28, 7  ;;  %v309_v35 = vld [vmem:[#allocation8] sm:$0xff]  ;;  %vm811_vm2 = vcmask 1043456  }
  0x8a   : > { %499 = vmatprep.subr.bf16.mxu0 %v1914_v3  ;;  %v1917_v7 = vld [vmem:[#allocation6 + $0x10] ss:$48 sps:$4 sm:$0xff]   ;;  %v284_v8 = vpack.c.bf16 %v283_v5, %v283_v5  ;;  %v1926_v11 = vld [vmem:[#allocation6 + $0x6c] ss:$48 sps:$4 sm:$0xff]   ;;  %v1922_v12 = vld [vmem:[#allocation6 + $0x74] ss:$48 sps:$4 sm:$0xff]  }
  0x8b   : > { %v1928_v13 = vld [vmem:[#allocation6 + $0x68] ss:$48 sps:$4 sm:$0xff]   ;;  %v1920_v14 = vld [vmem:[#allocation6 + $0x70] ss:$48 sps:$4 sm:$0xff]   ;;  %540 = vmatprep.subr.bf16.mxu1 %v1926_v11  ;;  %v1931_v15 = vld [vmem:[#allocation6 + $0x1c] ss:$48 sps:$4 sm:$0xff]  }
  0x8c   : > { %v1929_v16 = vld [vmem:[#allocation6 + $0x18] ss:$48 sps:$4 sm:$0xff]   ;;  %v1934_v17 = vld [vmem:[#allocation6 + $0x7c] ss:$48 sps:$4 sm:$0xff]   ;;  %v1937_v18 = vld [vmem:[#allocation6 + $0x24] ss:$48 sps:$4 sm:$0xff]  }
  0x8d   : > { %500 = vmatpush1.bf16.msra.mxu0 %v1916_v4  ;;  %541 = vmatpush1.bf16.msra.mxu1 %v1928_v13  ;;  %v1935_v19 = vld [vmem:[#allocation6 + $0x20] ss:$48 sps:$4 sm:$0xff]   ;;  %v1932_v20 = vld [vmem:[#allocation6 + $0x78] ss:$48 sps:$4 sm:$0xff]   ;;  %v1940_v21 = vld [vmem:[#allocation6 + $0x84] ss:$48 sps:$4 sm:$0xff]  }
  0x8e   : > { %579 = vmatprep.subr.bf16.mxu0 %v1919_v6  ;;  %620 = vmatprep.subr.bf16.mxu1 %v1931_v15  ;;  %v1938_v22 = vld [vmem:[#allocation6 + $0x80] ss:$48 sps:$4 sm:$0xff]   ;;  %v1941_v24 = vld [vmem:[#allocation6 + $0x28] ss:$48 sps:$4 sm:$0xff]   ;;  %v1943_v25 = vld [vmem:[#allocation6 + $0x2c] ss:$48 sps:$4 sm:$0xff]  }
  0x8f   : > { %v1946_v26 = vld [vmem:[#allocation6 + $0x8c] ss:$48 sps:$4 sm:$0xff]   ;;  %v1944_v27 = vld [vmem:[#allocation6 + $0x88] ss:$48 sps:$4 sm:$0xff]   ;;  %v331_v32 = vsub.s32 4, %v2451_v29  ;;  %v315_v37 = vsub.s32 0, %v2451_v29 }
  0x90   : > { %1668 = vmatmul.mubr.msk.bf16.vlgmr.msra.gmra.mrb[0].mxu0 %vm493_vm0, %v284_v8  ;;  %1669 = vmatmul.mubr.msk.bf16.vlgmr.msra.gmra.mrb[0].mxu1 %vm493_vm0, %v284_v8  ;;  %v335_v39 = vsub.s32 5, %v2451_v29  ;;  %v339_v51 = vsub.s32 6, %v2451_v29  ;;  %v319_v53 = vsub.s32 1, %v2451_v29  ;;  %v323_v1 = vsub.s32 2, %v2451_v29  ;;  %v2476_v15 = vld [vmem:[#allocation8 + $0x8] sm:$0xf] }
  0x91   : > { %580 = vmatpush1.bf16.msra.mxu0 %v1917_v7  ;;  %611 = vmatprep.mubr.bf16.mxu0 %v2197_v0  ;;  %v332_v36 = vrot.slane %v309_v35, %v331_v32  ;;  %v316_v46 = vrot.slane %v309_v35, %v315_v37  ;;  %v343_v2 = vsub.s32 7, %v2451_v29  ;;  %vm795_vm3 = vcmask 64512   ;;  %s1716_s11 = sshll.u32 %s2252_s22, 7  ;;  %s281_s13 = scalar_lea.vmem [#allocation11], %s1639_s16 }
  0x92   : > { %581 = vmatprep.subr.bf16.mxu0 %v1922_v12  ;;  %621 = vmatpush1.bf16.msra.mxu1 %v1929_v16  ;;  %v336_v49 = vrot.slane %v309_v35, %v335_v39  ;;  %v340_v58 = vrot.slane %v309_v35, %v339_v51  ;;  %v320_v61 = vrot.slane %v309_v35, %v319_v53  ;;  %s1531_s6 = sshll.u32 %s281_s13, 4  ;;  %s2525_s8 = scalar_lea.hbm %s2574_s5, %s1716_s11  ;;  %s2527_s6 = int_to_ptr.vmem [resolvable:$true] %s1531_s6 }
  0x93   : > { %652 = vmatprep.mubr.bf16.mxu1 %v2197_v0  ;;  %622 = vmatprep.subr.bf16.mxu1 %v1934_v17  ;;  %v324_v5 = vrot.slane %v309_v35, %v323_v1  ;;  %v344_v6 = vrot.slane %v309_v35, %v343_v2  ;;  %v348_v16 = vrot.slane %v2476_v15, %v315_v37  ;;  %s1518_s22 = scalar_lea.sflag [#allocation5], %s2421_s15  ;;  %s2113_s29 = scalar_lea.vmem %s2527_s6, 128 }
  0x94   : > { %p2114_p10 = scmp.ne.s32.totalorder %s2527_s6, %s2113_s29  ;;  %s2200_s9 = smov [#allocation11]  }
  0x95   : > { %582 = vmatpush1.bf16.msra.mxu0 %v1920_v14  ;;  %s2117_s10 = sshll.u32 %s2200_s9, 4  ;;  %s2118_s10 = int_to_ptr.vmem [resolvable:$false] %s2117_s10 }
  0x96   : > { %661 = vmatprep.subr.bf16.mxu0 %v1937_v18  ;;  %623 = vmatpush1.bf16.msra.mxu1 %v1932_v20  ;;  %p2115_p3 = pnand %p2114_p10, %p2376_p5  ;;  %s2119_s12 = scalar_lea.vmem %s2118_s10, 256 }
  0x97   : > { %702 = vmatprep.subr.bf16.mxu1 %v1943_v25  ;;  %p2120_p12 = scmp.lt.s32.totalorder %s2527_s6, %s2118_s10  ;;  %p2121_p2 = scmp.lt.s32.totalorder %s2119_s12, %s2113_s29 }
  0x98   : > { %1670 = vmatmul.mubr.msk.bf16.vlgmr.msra.gmra.mrb[4].mxu0 %vm493_vm0, %v284_v8  ;;  %p2116_p7 = pneg %p2115_p3 }
  0x99   : > { %662 = vmatpush1.bf16.msra.mxu0 %v1935_v19  ;;  %693 = vmatprep.mubr.bf16.mxu0 %v2197_v0  ;;  %p2122_p1 = por %p2121_p2, %p2120_p12 }
  0x9a   : > { %1671 = vmatmul.mubr.msk.bf16.vlgmr.msra.gmra.mrb[4].mxu1 %vm493_vm0, %v284_v8  ;;  %663 = vmatprep.subr.bf16.mxu0 %v1940_v21 }
  0x9b   : > { %734 = vmatprep.mubr.bf16.mxu1 %v2197_v0  ;;  %703 = vmatpush1.bf16.msra.mxu1 %v1941_v24  ;;  %p2123_p4 = pnand %p2122_p1, %p2116_p7 }
  0x9c   : > { %704 = vmatprep.subr.bf16.mxu1 %v1946_v26 }
  0x9d   : > { %664 = vmatpush1.bf16.msra.mxu0 %v1938_v22 }
  0x9e   : > { %1779 = vmatprep.subr.bf16.mxu0 %v2198_v23 }
  0x9f   : > { %705 = vmatpush1.bf16.msra.mxu1 %v1944_v27 }
  0xa0   : > { %1672 = vmatmul.mubr.msk.bf16.vlgmr.msra.gmra.mrb[8].mxu0 %vm493_vm0, %v284_v8  ;;  %1785 = vmatprep.subr.bf16.mxu1 %v2198_v23 }
  0xa1   : > { %1781 = vmatprep.mubr.msk.bf16.mxu0 %vm2199_vm1, %v2198_v23 }
  0xa2   : > { %1673 = vmatmul.mubr.msk.bf16.vlgmr.msra.gmra.mrb[8].mxu1 %vm493_vm0, %v284_v8  ;;  %v327_v8 = vsub.s32 3, %v2451_v29 }
  0xa3   : > { %1787 = vmatprep.mubr.msk.bf16.mxu1 %vm2199_vm1, %v2198_v23 }
  0xa4   : > { %v328_v11 = vrot.slane %v309_v35, %v327_v8 }
 0x163   : > { %v531_v30 = vpop.f32.mrb[0].mxu0  ;;  %v572_v38 = vpop.f32.mrb[0].mxu1 }
 0x164   : > { %v533_v31 = vpop.f32.mrb[1].mxu0  ;;  %v574_v40 = vpop.f32.mrb[1].mxu1  ;;  %v532_v52 = vadd.f32 %v531_v30, %v316_v46  ;;  %v573_v7 = vadd.f32 %v572_v38, %v324_v5 }
 0x165   : > { %v535_v33 = vpop.f32.mrb[2].mxu0  ;;  %v576_v42 = vpop.f32.mrb[2].mxu1  ;;  %v534_v0 = vadd.f32 %v533_v31, %v320_v61  ;;  %v575_v13 = vadd.f32 %v574_v40, %v328_v11  ;;  %v1949_v11 = vld [vmem:[#allocation9 + $0x48] sm:$0xff]  }
 0x166   : > { %v536_v34 = vpop.f32.mrb[3].mxu0  ;;  %v577_v45 = vpop.f32.mrb[3].mxu1  ;;  %v743_v60 = vpack.c.bf16 %v532_v52, %v532_v52  ;;  %v745_v10 = vpack.c.bf16 %v573_v7, %v573_v7 }
 0x167   : > { %v744_v4 = vpack.c.bf16 %v534_v0, %v534_v0  ;;  %v746_v14 = vpack.c.bf16 %v575_v13, %v575_v13  ;;  %v1951_v13 = vld [vmem:[#allocation9 + $0x50] sm:$0xff]  }
 0x16b   : > { %v613_v41 = vpop.f32.mrb[4].mxu0 }
 0x16c   : > { %v614_v43 = vadd.f32 %v613_v41, %v332_v36  ;;  %v615_v44 = vpop.f32.mrb[5].mxu0 }
 0x16d   : > { %v617_v47 = vpop.f32.mrb[6].mxu0  ;;  %v654_v54 = vpop.f32.mrb[4].mxu1  ;;  %v616_v55 = vadd.f32 %v615_v44, %v336_v49 }
 0x16e   : > { %v747_v48 = vpack.c.bf16 %v614_v43, %v614_v43  ;;  %v618_v50 = vpop.f32.mrb[7].mxu0  ;;  %v656_v56 = vpop.f32.mrb[5].mxu1  ;;  %v655_v63 = vadd.f32 %v654_v54, %v340_v58 }
 0x16f   : > { %v658_v57 = vpop.f32.mrb[6].mxu1  ;;  %v748_v62 = vpack.c.bf16 %v616_v55, %v616_v55  ;;  %v657_v9 = vadd.f32 %v656_v56, %v344_v6 }
 0x170   : > { %1780 = vmatpush3.bf16.xpose.msra.mxu0 %v747_v48  ;;  %v659_v59 = vpop.f32.mrb[7].mxu1  ;;  %v749_v3 = vpack.c.bf16 %v655_v63, %v655_v63 }
 0x171   : > { %1791 = vmatprep.subr.bf16.mxu0 %v2198_v23  ;;  %v750_v12 = vpack.c.bf16 %v657_v9, %v657_v9  ;;  %v1947_v9 = vld [vmem:[#allocation9 + $0x40] sm:$0xff]  }
 0x173   : > { %v695_v17 = vpop.f32.mrb[8].mxu0 }
 0x174   : > { %v696_v18 = vadd.f32 %v695_v17, %v348_v16  ;;  %v2479_v19 = vpop.f32.mrb[9].mxu0  ;;  %v352_v17 = vrot.slane %v2476_v15, %v319_v53 }
 0x175   : > { %v699_v20 = vpop.f32.mrb[10].mxu0 }
 0x176   : > { %v751_v21 = vpack.c.bf16 %v696_v18, %v696_v18  ;;  %v700_v22 = vpop.f32.mrb[11].mxu0  ;;  %v698_v18 = vadd.f32 %v2479_v19, %v352_v17 }
 0x177   : > { %1782 = vmatmul.mubr.bf16.vlgmr.msra.gmra.mrb[12].mxu0 %v743_v60 }
 0x178   : > { %1792 = vmatpush3.bf16.xpose.msra.mxu0 %v748_v62  ;;  %1793 = vmatprep.mubr.msk.bf16.mxu0 %vm2199_vm1, %v2198_v23  ;;  %v813_v24 = vsel %vm811_vm2, %v751_v21, 0  ;;  %v356_v21 = vrot.slane %v2476_v15, %v323_v1 }
 0x179   : > { %1803 = vmatprep.subr.bf16.mxu0 %v2198_v23  ;;  %1786 = vmatpush3.bf16.msra.mxu1 %v813_v24  ;;  %v752_v24 = vpack.c.bf16 %v698_v18, %v698_v18 }
 0x17a   : > { %1797 = vmatprep.subr.bf16.mxu1 %v2198_v23 }
 0x17f   : > { %1794 = vmatmul.mubr.bf16.vlgmr.msra.gmra.mrb[16].mxu0 %v744_v4  ;;  %v736_v4 = vpop.f32.mrb[8].mxu1 }
 0x180   : > { %1804 = vmatpush3.bf16.xpose.msra.mxu0 %v749_v3  ;;  %1805 = vmatprep.mubr.msk.bf16.mxu0 %vm2199_vm1, %v2198_v23  ;;  %v738_v5 = vpop.f32.mrb[9].mxu1 }
 0x181   : > { %1815 = vmatprep.subr.bf16.mxu0 %v2198_v23  ;;  %v740_v6 = vpop.f32.mrb[10].mxu1 }
 0x182   : > { %v741_v7 = vpop.f32.mrb[11].mxu1 }
 0x187   : > { %1806 = vmatmul.mubr.bf16.vlgmr.msra.gmra.mrb[20].mxu0 %v745_v10  ;;  %v1948_v10 = vld [vmem:[#allocation9] sm:$0xff]  }
 0x188   : > { %1816 = vmatpush3.bf16.xpose.msra.mxu0 %v750_v12  ;;  %1817 = vmatprep.mubr.msk.bf16.mxu0 %vm2199_vm1, %v2198_v23  ;;  %v1950_v12 = vld [vmem:[#allocation9 + $0x8] sm:$0xff]  }
 0x189   : > { %1735 = vmatprep.subr.bf16.mxu0 %v1947_v9 }
 0x18f   : > { %1818 = vmatmul.mubr.bf16.vlgmr.msra.gmra.mrb[24].mxu0 %v746_v14  ;;  %v1952_v14 = vld [vmem:[#allocation9 + $0x10] sm:$0xff]  }
 0x190   : > { %1736 = vmatpush3.bf16.msra.mxu0 %v1948_v10 }
 0x191   : > { %1737 = vmatprep.subr.bf16.mxu0 %v1949_v11 }
 0x194   : > { %1738 = vmatpush3.bf16.msra.mxu0 %v1950_v12 }
 0x195   : > { %1739 = vmatprep.subr.bf16.mxu0 %v1951_v13 }
 0x198   : > { %1740 = vmatpush3.bf16.msra.mxu0 %v1952_v14 }
 0x24a   : > { %v789_v25 = vpop.f32.mrb[12].mxu0 }
 0x24b   : > { %v1783_v26 = vpop.f32.mrb[13].mxu0  ;;  %v796_v27 = vsel %vm795_vm3, %v789_v25, -inf }
 0x24c   : > { %797 = vmax.xlane.f32.xlu0 %v796_v27  ;;  %v792_v28 = vpop.f32.mrb[14].mxu0  ;;  %v737_v26 = vadd.f32 %v736_v4, %v356_v21 }
 0x24d   : > { %v1784_v30 = vpop.f32.mrb[15].mxu0  ;;  %v913_v28 = vsel %vm811_vm2, %v752_v24, 0 }
 0x24e   : > { %v753_v53 = vpack.c.bf16 %v737_v26, %v737_v26 }
 0x252   : > { %v891_v31 = vpop.f32.mrb[16].mxu0 }
 0x253   : > { %v1795_v32 = vpop.f32.mrb[17].mxu0  ;;  %v897_v33 = vsel %vm795_vm3, %v891_v31, -inf }
 0x254   : > { %898 = vmax.xlane.f32.xlu0 %v897_v33  ;;  %v894_v34 = vpop.f32.mrb[18].mxu0  ;;  %v1013_v32 = vsel %vm811_vm2, %v753_v53, 0 }
 0x255   : > { %v1796_v35 = vpop.f32.mrb[19].mxu0 }
 0x25a   : > { %v991_v36 = vpop.f32.mrb[20].mxu0 }
 0x25b   : > { %v1807_v37 = vpop.f32.mrb[21].mxu0  ;;  %v997_v38 = vsel %vm795_vm3, %v991_v36, -inf }
 0x25c   : > { %998 = vmax.xlane.f32.xlu1 %v997_v38  ;;  %v994_v39 = vpop.f32.mrb[22].mxu0 }
 0x25d   : > { %v1808_v40 = vpop.f32.mrb[23].mxu0 }
 0x262   : > { %v1091_v41 = vpop.f32.mrb[24].mxu0 }
 0x263   : > { %v1819_v42 = vpop.f32.mrb[25].mxu0  ;;  %v1097_v43 = vsel %vm795_vm3, %v1091_v41, -inf }
 0x264   : > { %1098 = vmax.xlane.f32.xlu1 %v1097_v43  ;;  %v1094_v44 = vpop.f32.mrb[26].mxu0  ;;  %v1954_v42 = vld [vmem:[#allocation9 + $0x18] sm:$0xff]   ;;  %v1955_v43 = vld [vmem:[#allocation9 + $0x60] sm:$0xff]  }
 0x265   : > { %v1820_v45 = vpop.f32.mrb[27].mxu0  ;;  %v1956_v44 = vld [vmem:[#allocation9 + $0xc0] sm:$0xff]  }
 0x266   : > { %v1957_v45 = vld [vmem:[#allocation9 + $0x20] sm:$0xff]  }
 0x2d9   : > { %v798_v46 = vpop.xlane.xlu0 %797 }
 0x2da   : > { %v799_v47 = vsub.f32 %v789_v25, %v798_v46  ;;  %v1958_v46 = vld [vmem:[#allocation9 + $0x80] sm:$0xff]  }
 0x2dc   : > { %v800_v48 = vmul.f32 1.442695, %v799_v47  ;;  %v1959_v47 = vld [vmem:[#allocation9 + $0x68] sm:$0xff]  }
 0x2de   : > { %1983 = vpow2.f32 %v800_v48  ;;  %v1960_v48 = vld [vmem:[#allocation9 + $0xc8] sm:$0xff]  }
 0x2e1   : > { %v899_v49 = vpop.xlane.xlu0 %898 }
 0x2e2   : > { %v900_v50 = vsub.f32 %v891_v31, %v899_v49  ;;  %v360_v31 = vrot.slane %v2476_v15, %v327_v8  ;;  %v1962_v49 = vld [vmem:[#allocation9 + $0x88] sm:$0xff]  }
 0x2e4   : > { %v901_v51 = vmul.f32 1.442695, %v900_v50  ;;  %v739_v34 = vadd.f32 %v738_v5, %v360_v31  ;;  %v1963_v50 = vld [vmem:[#allocation9 + $0x70] sm:$0xff]  }
 0x2e6   : > { %1985 = vpow2.f32 %v901_v51  ;;  %v754_v38 = vpack.c.bf16 %v739_v34, %v739_v34  ;;  %v1964_v51 = vld [vmem:[#allocation9 + $0xd0] sm:$0xff]  }
 0x2e8   : > { %v1984_v52 = vpop.eup %1983  ;;  %v1113_v8 = vsel %vm811_vm2, %v754_v38, 0 }
 0x2e9   : > { %v999_v54 = vpop.xlane.xlu1 %998  ;;  %v802_v55 = vsel %vm795_vm3, %v1984_v52, 0.0 }
 0x2ea   : > { %v1000_v56 = vsub.f32 %v991_v36, %v999_v54  ;;  %803 = vadd.xlane.f32.xlu0 %v802_v55  ;;  %v1966_v54 = vld [vmem:[#allocation9 + $0x90] sm:$0xff]   ;;  %v1967_v55 = vld [vmem:[#allocation9 + $0x78] sm:$0xff]  }
 0x2ec   : > { %v1001_v57 = vmul.f32 1.442695, %v1000_v56  ;;  %v1968_v56 = vld [vmem:[#allocation9 + $0xd8] sm:$0xff]  }
 0x2ee   : > { %1987 = vpow2.f32 %v1001_v57  ;;  %v1969_v57 = vld [vmem:[#allocation9 + $0x38] sm:$0xff]  }
 0x2f0   : > { %v1986_v58 = vpop.eup %1985 }
 0x2f1   : > { %v1099_v59 = vpop.xlane.xlu1 %1098  ;;  %v903_v60 = vsel %vm795_vm3, %v1986_v58, 0.0 }
 0x2f2   : > { %v1100_v61 = vsub.f32 %v1091_v41, %v1099_v59  ;;  %904 = vadd.xlane.f32.xlu1 %v903_v60  ;;  %v1953_v41 = vld [vmem:[#allocation9 + $0x58] sm:$0xff]   ;;  %v1973_v59 = vld [vmem:[#allocation9 + $0xe0] sm:$0xff]  }
 0x2f3   : > { %1741 = vmatprep.subr.bf16.mxu0 %v1953_v41  ;;  %v1974_v60 = vld [vmem:[#allocation9 + $0xa0] sm:$0xff]  }
 0x2f4   : > { %v1101_v62 = vmul.f32 1.442695, %v1100_v61  ;;  %1742 = vmatpush3.bf16.msra.mxu0 %v1954_v42  ;;  %v1975_v61 = vld [vmem:[#allocation9 + $0xe8] sm:$0xff]  }
 0x2f5   : > { %1743 = vmatprep.subr.bf16.mxu0 %v1955_v43 }
 0x2f6   : > { %1989 = vpow2.f32 %v1101_v62  ;;  %v1976_v62 = vld [vmem:[#allocation9 + $0xa8] sm:$0xff]  }
 0x2f8   : > { %v1988_v63 = vpop.eup %1987  ;;  %1744 = vmatpush3.bf16.msra.mxu0 %v1957_v45 }
 0x2f9   : > { %v1003_v0 = vsel %vm795_vm3, %v1988_v63, 0.0  ;;  %1745 = vmatprep.subr.bf16.mxu0 %v1959_v47 }
 0x2fa   : > { %1004 = vadd.xlane.f32.xlu0 %v1003_v0  ;;  %v1978_v0 = vld [vmem:[#allocation9 + $0xb0] sm:$0xff]  }
 0x300   : > { %v1990_v2 = vpop.eup %1989 }
 0x301   : > { %v1103_v3 = vsel %vm795_vm3, %v1990_v2, 0.0 }
 0x302   : > { %1104 = vadd.xlane.f32.xlu1 %v1103_v3  ;;  %v1980_v3 = vld [vmem:[#allocation9 + $0xb8] sm:$0xff]  }
 0x377   : > { %v804_v16 = vpop.xlane.xlu0 %803 }
 0x378   : > { %1991 = vrcp.f32 %v804_v16 }
 0x37f   : > { %v905_v20 = vpop.xlane.xlu1 %904 }
 0x380   : > { %1993 = vrcp.f32 %v905_v20 }
 0x382   : > { %v1992_v22 = vpop.eup %1991 }
 0x383   : > { %v806_v25 = vmul.f32 %v1992_v22, %v1984_v52  ;;  %v1965_v52 = vld [vmem:[#allocation9 + $0x30] sm:$0xff]  }
 0x385   : > { %v807_v27 = vpack.c.bf16 %v806_v25, %v806_v25 }
 0x387   : > { %1788 = vmatmul.mubr.msk.bf16.vlgmr.msra.gmra.mrb[12].mxu1 %vm795_vm3, %v807_v27  ;;  %v1005_v30 = vpop.xlane.xlu0 %1004 }
 0x388   : > { %1798 = vmatpush3.bf16.msra.mxu1 %v913_v28  ;;  %1995 = vrcp.f32 %v1005_v30  ;;  %1799 = vmatprep.mubr.msk.bf16.mxu1 %vm2199_vm1, %v2198_v23 }
 0x389   : > { %1809 = vmatprep.subr.bf16.mxu1 %v2198_v23 }
 0x38a   : > { %v1994_v19 = vpop.eup %1993 }
 0x38b   : > { %v907_v1 = vmul.f32 %v1994_v19, %v1986_v58  ;;  %v1970_v58 = vld [vmem:[#allocation9 + $0x98] sm:$0xff]  }
 0x38d   : > { %v908_v33 = vpack.c.bf16 %v907_v1, %v907_v1 }
 0x38f   : > { %1800 = vmatmul.mubr.msk.bf16.vlgmr.msra.gmra.mrb[16].mxu1 %vm795_vm3, %v908_v33  ;;  %v1105_v35 = vpop.xlane.xlu1 %1104 }
 0x390   : > { %1997 = vrcp.f32 %v1105_v35  ;;  %1810 = vmatpush3.bf16.msra.mxu1 %v1013_v32  ;;  %1811 = vmatprep.mubr.msk.bf16.mxu1 %vm2199_vm1, %v2198_v23 }
 0x391   : > { %1821 = vmatprep.subr.bf16.mxu1 %v2198_v23 }
 0x392   : > { %v1996_v36 = vpop.eup %1995 }
 0x393   : > { %v1007_v37 = vmul.f32 %v1996_v36, %v1988_v63  ;;  %v1977_v63 = vld [vmem:[#allocation9 + $0xf0] sm:$0xff]  }
 0x395   : > { %v1008_v29 = vpack.c.bf16 %v1007_v37, %v1007_v37  ;;  %v1678_v37 = vld [vmem:[%s2573_s4] ss:$0 sm:$0xff] }
 0x397   : > { %1812 = vmatmul.mubr.msk.bf16.vlgmr.msra.gmra.mrb[20].mxu1 %vm795_vm3, %v1008_v29 }
 0x398   : > { %1822 = vmatpush3.bf16.msra.mxu1 %v1113_v8  ;;  %1823 = vmatprep.mubr.msk.bf16.mxu1 %vm2199_vm1, %v2198_v23  ;;  %v1961_v23 = vld [vmem:[#allocation9 + $0x28] sm:$0xff]  }
 0x399   : > { %1757 = vmatprep.subr.bf16.mxu1 %v1956_v44  ;;  %1746 = vmatpush3.bf16.msra.mxu0 %v1961_v23 }
 0x39a   : > { %v1998_v15 = vpop.eup %1997  ;;  %1747 = vmatprep.subr.bf16.mxu0 %v1963_v50 }
 0x39b   : > { %v1107_v39 = vmul.f32 %v1998_v15, %v1990_v2  ;;  %v1979_v2 = vld [vmem:[#allocation9 + $0xf8] sm:$0xff]  }
 0x39d   : > { %v1108_v40 = vpack.c.bf16 %v1107_v39, %v1107_v39  ;;  %1748 = vmatpush3.bf16.msra.mxu0 %v1965_v52 }
 0x39e   : > { %1749 = vmatprep.subr.bf16.mxu0 %v1967_v55 }
 0x39f   : > { %1824 = vmatmul.mubr.msk.bf16.vlgmr.msra.gmra.mrb[24].mxu1 %vm795_vm3, %v1108_v40 }
 0x3a0   : > { %1758 = vmatpush3.bf16.msra.mxu1 %v1958_v46 }
 0x3a1   : > { %1759 = vmatprep.subr.bf16.mxu1 %v1960_v48  ;;  %1750 = vmatpush3.bf16.msra.mxu0 %v1969_v57 }
 0x3a4   : > { %1760 = vmatpush3.bf16.msra.mxu1 %v1962_v49 }
 0x3a5   : > { %1761 = vmatprep.subr.bf16.mxu1 %v1964_v51 }
 0x3a8   : > { %1762 = vmatpush3.bf16.msra.mxu1 %v1966_v54 }
 0x3a9   : > { %1763 = vmatprep.subr.bf16.mxu1 %v1968_v56 }
 0x3ac   : > { %1764 = vmatpush3.bf16.msra.mxu1 %v1970_v58 }
 0x3ad   : > { %1765 = vmatprep.subr.bf16.mxu1 %v1973_v59 }
 0x3b0   : > { %1766 = vmatpush3.bf16.msra.mxu1 %v1974_v60 }
 0x3b1   : > { %1767 = vmatprep.subr.bf16.mxu1 %v1975_v61 }
 0x3b4   : > { %1768 = vmatpush3.bf16.msra.mxu1 %v1976_v62 }
 0x3b5   : > { %1769 = vmatprep.subr.bf16.mxu1 %v1977_v63 }
 0x3b8   : > { %1770 = vmatpush3.bf16.msra.mxu1 %v1978_v0 }
 0x3b9   : > { %1771 = vmatprep.subr.bf16.mxu1 %v1979_v2 }
 0x3bc   : > { %1772 = vmatpush3.bf16.msra.mxu1 %v1980_v3 }
 0x45a   : > { %v849_v4 = vpop.f32.mrb[12].mxu1 }
 0x45b   : > { %v855_v5 = vpack.c.bf16 %v849_v4, %v849_v4  ;;  %v1789_v6 = vpop.f32.mrb[13].mxu1 }
 0x45c   : > { %v852_v7 = vpop.f32.mrb[14].mxu1 }
 0x45d   : > { %856 = vst [vmem:[#allocation2] sm:$0xf] %v855_v5  ;;  %v1790_v9 = vpop.f32.mrb[15].mxu1 }
 0x462   : > { %v949_v10 = vpop.f32.mrb[16].mxu1 }
 0x463   : > { %v955_v11 = vpack.c.bf16 %v949_v10, %v949_v10  ;;  %v1801_v12 = vpop.f32.mrb[17].mxu1 }
 0x464   : > { %v952_v13 = vpop.f32.mrb[18].mxu1 }
 0x465   : > { %956 = vst [vmem:[#allocation2 + $0x4] sm:$0xf] %v955_v11  ;;  %v1802_v14 = vpop.f32.mrb[19].mxu1 }
 0x46a   : > { %v1049_v16 = vpop.f32.mrb[20].mxu1 }
 0x46b   : > { %v1055_v17 = vpack.c.bf16 %v1049_v16, %v1049_v16  ;;  %v1813_v18 = vpop.f32.mrb[21].mxu1 }
 0x46c   : > { %v1052_v20 = vpop.f32.mrb[22].mxu1  ;;  %v1157_v21 = vld [vmem:[#allocation2] sm:$0xff] }
 0x46d   : > { %1056 = vst [vmem:[#allocation2 + $0x8] sm:$0xf] %v1055_v17  ;;  %v1814_v22 = vpop.f32.mrb[23].mxu1  ;;  %v1679_v24 = vcombine.low %v1157_v21, %v1157_v21  ;;  %v1680_v25 = vcombine.high %v1157_v21, %v1157_v21 }
 0x46f   : > { %1468 = vmatprep.mubr.bf16.mxu0 %v1680_v25 }
 0x470   : > { %1469 = vmatmul.mubr.bf16.vlgmr.msra.gmra.mrb[28].mxu0 %v1679_v24 }
 0x472   : > { %v1149_v26 = vpop.f32.mrb[24].mxu1 }
 0x473   : > { %v1155_v27 = vpack.c.bf16 %v1149_v26, %v1149_v26  ;;  %v1825_v28 = vpop.f32.mrb[25].mxu1 }
 0x474   : > { %v1152_v30 = vpop.f32.mrb[26].mxu1 }
 0x475   : > { %1156 = vst [vmem:[#allocation2 + $0xc] sm:$0xf] %v1155_v27  ;;  %v1826_v53 = vpop.f32.mrb[27].mxu1 }
 0x47c   : > { %v1158_v19 = vld [vmem:[#allocation2 + $0x8] sm:$0xff] }
 0x47d   : > { %v1681_v1 = vcombine.low %v1158_v19, %v1158_v19  ;;  %v1682_v31 = vcombine.high %v1158_v19, %v1158_v19 }
 0x47f   : > { %1508 = vmatprep.mubr.bf16.mxu1 %v1682_v31 }
 0x480   : > { %1509 = vmatmul.mubr.bf16.vlgmr.msra.gmra.mrb[28].mxu1 %v1681_v1 }
 0x543   : > { %v1751_v32 = vpop.f32.mrb[28].mxu0 }
 0x544   : > { %v1752_v33 = vpop.f32.mrb[29].mxu0 }
 0x545   : > { %v1753_v34 = vadd.f32 %v1752_v33, %v1751_v32  ;;  %v1754_v35 = vpop.f32.mrb[30].mxu0 }
 0x546   : > { %v1755_v36 = vpop.f32.mrb[31].mxu0 }
 0x547   : > { %v1471_v8 = vadd.f32 %v1753_v34, %v1678_v37 }
 0x553   : > { %v1773_v38 = vpop.f32.mrb[28].mxu1 }
 0x554   : > { %v1774_v29 = vpop.f32.mrb[29].mxu1 }
 0x555   : > { %v1775_v15 = vadd.f32 %v1774_v29, %v1773_v38  ;;  %v1776_v39 = vpop.f32.mrb[30].mxu1 }
 0x556   : > { %v1777_v40 = vpop.f32.mrb[31].mxu1 }
 0x557   : > { %v1511_v41 = vadd.f32 %v1775_v15, %v1471_v8 }
 0x559   : > { %1516 = vst [vmem:[%s281_s13] sm:$0xff] %v1511_v41 }
 0x55a   : > { %2126 = shalt.err (!%p2123_p4)
}
 0x55b   : > { %s2127_s15 = scalar_lea.hbm %s2525_s8, 128  ;;  %s2131_s23 = scalar_lea.hbm %s2574_s5, 256 }
 0x55c   : > { %p2128_p0 = scmp.ne.s32.totalorder %s2525_s8, %s2127_s15  ;;  %p2132_p8 = scmp.lt.u32.totalorder %s2525_s8, %s2574_s5 }
 0x55d   : > { %p2133_p13 = scmp.lt.u32.totalorder %s2131_s23, %s2127_s15  ;;  %p2135_p10 = scmp.lt.u32.totalorder %s2127_s15, %s2525_s8 }
 0x55e   : > { %p2129_p9 = pnand %p2128_p0, %p2376_p5 }
 0x55f   : > { %p2134_p6 = por %p2133_p13, %p2132_p8 }
 0x560   : > { %p2130_p11 = pneg %p2129_p9 }
 0x561   : > { %p2136_p3 = por %p2135_p10, %p2134_p6 }
 0x563   : > { %p2137_p7 = pnand %p2136_p3, %p2130_p11 }
 0x565   : > { %2140 = shalt.err (!%p2137_p7)
}
 0x566   : > { %1841 = dma.vmem_to_hbm [thread:$0]  (%p2376_p5), %s2527_s6, 128, %s2525_s8, %s1518_s22  }
 0x567 PF: > { %s1543_s11 = sand.u32 1, %s2175_s18   ;;  %p2592_p12 = scmp.ne.s32.totalorder %s2579_s25, 0 }
 0x568   : > { %p2593_p2 = scmp.ge.s32.totalorder %s2187_s21, 2  ;;  %s1544_s13 = scalar_lea.sflag [#allocation5], %s1543_s11 }
 0x56a   : > { %p1858_p1 = pnand %p2593_p2, %p2592_p12 }
 0x56c   : > { %2170 = dma.done.wait (!%p1858_p1), %s1544_s13, 128  }
 0x56d   : > { %2172 = vsyncadd (!%p1858_p1), %s1544_s13, 4294967168  ;;  %p20_p4 = scmp.ge.s32.totalorder %s2362_s28, 4   ;;  %s2594_s18 = smov %s2179_s19 }
 0x56e   : > { %s2595_s19 = smov %s2183_s20  ;;  %s2596_s20 = smov %s2372_s27 }
 0x56f   : > { %s2597_s21 = smov %s2362_s28  ;;  %22 = sbr.rel (!%p20_p4) target bundleno = 7 (0x7), region = 97 }
 0x576   :  { %1549 = vsyncpa [#allocation4], 1 }
 0x577   :  { %1551 = vsyncpa [#allocation4 + $0x1], 1 }
 0x578   :  { %1552 = vsyncpa [#allocation7], 1 }
 0x579   :  { %1553 = vsyncpa [#allocation10], 1 }
 0x57a   :  { %1554 = vsyncpa [#allocation5], 1 }
 0x57b   :  { %1556 = vsyncpa [#allocation5 + $0x1], 1 }

</bundles_post_ra>
